<compile_context>
chip_gen: v6e
topology: v6e:2x2x1
jax: 0.10.0
libtpu: 0.0.40
codegen_flags: <defaults>
</compile_context>

<pallas_src>
from functools import partial

import jax
import jax.numpy as jnp
from jax import lax
from jax.experimental import pallas as pl
from jax.experimental.pallas import tpu as pltpu

EPS = 1e-5
F32 = jnp.float32


def _round_up(n, m):
    return ((n + m - 1) // m) * m


# --------------------------------- kernel ------------------------------------

def _patch_embed_kernel(apply_norm, *refs):
    # refs (no norm):  x_ref (TM, K), w_ref (K, E), b_ref (1, E), o_ref (TM, E)
    # refs (norm):     ... plus g_ref (1, E), beta_ref (1, E) before o_ref
    if apply_norm:
        x_ref, w_ref, b_ref, g_ref, beta_ref, o_ref = refs
    else:
        x_ref, w_ref, b_ref, o_ref = refs

    x = x_ref[...].astype(F32)                                           # [TM, K]
    y = jnp.dot(x, w_ref[...].astype(F32),
                preferred_element_type=F32,
                precision=lax.Precision.HIGHEST) + b_ref[...].astype(F32)  # [TM, E]
    if apply_norm:
        mu = jnp.mean(y, axis=-1, keepdims=True)
        var = jnp.mean(y * y, axis=-1, keepdims=True) - mu * mu   # single pass
        y = (y - mu) * lax.rsqrt(var + EPS) * g_ref[...].astype(F32) \
            + beta_ref[...].astype(F32)
    o_ref[...] = y.astype(o_ref.dtype)


# -------------------------------- wrapper -------------------------------------

def patch_embedding(x, params, patch_size, *, tile_m=2048):
    """PatchEmbedding.forward.  x: (B, in_c, H, W) (NCHW, PyTorch layout).
    Returns (B, H//P, W//P, embed_dim) (B H W C, as after the einops rearrange)."""
    P = patch_size
    w = params["w"]                      # (E, C, P, P) conv weight (PyTorch layout)
    b = params["b"]                      # (E,)
    gamma = params.get("gamma", None)    # (E,) or None  (norm_layer=None -> Identity)
    beta = params.get("beta", None)

    B, C, H, W = x.shape
    # Faithful replication of PatchEmbedding.padding: the reference pads BOTH
    # spatial dims whenever either is non-divisible (which adds a full extra
    # patch of zeros on an already-divisible dim) -- reproduced exactly here.
    if H % P != 0 or W % P != 0:
        x = jnp.pad(x, ((0, 0), (0, 0), (0, P - H % P), (0, P - W % P)))
        B, C, H, W = x.shape
    Hp, Wp = H // P, W // P

    # Patch extraction (layout only).  Flatten order (c, i, j) matches the
    # conv-weight flatten order W[e, c, i, j].
    K = C * P * P
    E = w.shape[0]
    tokens = (x.reshape(B, C, Hp, P, Wp, P)
                .transpose(0, 2, 4, 1, 3, 5)           # (B, Hp, Wp, C, P, P)
                .reshape(B * Hp * Wp, K))
    wmat = w.reshape(E, K).T                           # (K, E)

    N = tokens.shape[0]
    # Large token tile (amortize per-step overhead), but keep >= 2 grid steps
    # when possible so the "parallel" axis feeds both v7x TensorCores.
    TM = max(8, min(tile_m, _round_up(-(-N // 2), 8)))
    Npad = _round_up(N, TM)
    if Npad != N:
        tokens = jnp.pad(tokens, ((0, Npad - N), (0, 0)))

    apply_norm = gamma is not None
    kernel = partial(_patch_embed_kernel, apply_norm)

    in_arrays = [tokens, wmat, b.reshape(1, E)]
    in_specs = [
        pl.BlockSpec((TM, K), lambda i: (i, 0)),       # token tile (pipelined)
        pl.BlockSpec((K, E), lambda i: (0, 0)),        # weight, VMEM-resident
        pl.BlockSpec((1, E), lambda i: (0, 0)),        # bias,   VMEM-resident
    ]
    if apply_norm:
        in_arrays += [gamma.reshape(1, E), beta.reshape(1, E)]
        in_specs += [pl.BlockSpec((1, E), lambda i: (0, 0)),
                     pl.BlockSpec((1, E), lambda i: (0, 0))]

    out = pl.pallas_call(
        kernel,
        out_shape=jax.ShapeDtypeStruct((Npad, E), x.dtype),
        grid=(Npad // TM,),
        in_specs=in_specs,
        out_specs=pl.BlockSpec((TM, E), lambda i: (i, 0)),
        compiler_params=pltpu.CompilerParams(dimension_semantics=("parallel",)),
    )(*in_arrays)

    return out[:N].reshape(B, Hp, Wp, E)


# ------------------------------ parameter setup --------------------------------

def init_params(key, patch_size, in_c, embed_dim, with_norm=False):
    kw, kb = jax.random.split(key)
    fan_in = in_c * patch_size * patch_size
    p = dict(
        w=jax.random.normal(kw, (embed_dim, in_c, patch_size, patch_size), F32)
          * (1.0 / jnp.sqrt(fan_in)),
        b=jax.random.normal(kb, (embed_dim,), F32) * 0.02,
    )
    if with_norm:                                       # norm_layer=nn.LayerNorm
        p["gamma"] = jnp.ones((embed_dim,), F32)
        p["beta"] = jnp.zeros((embed_dim,), F32)
    return p


# ----------------------------------- main ---------------------------------------

if __name__ == "__main__":
    # Default PatchEmbedding(): patch_size=4, in_c=3, embed_dim=96, norm_layer=None.
    patch_size, in_c, embed_dim = 4, 3, 96
    B, H, W = 2, 64, 64

    key = jax.random.PRNGKey(0)
    kx, kp, kx2 = jax.random.split(key, 3)
    x = jax.random.normal(kx, (B, in_c, H, W), F32)
    params = init_params(kp, patch_size, in_c, embed_dim, with_norm=False)

    out = patch_embedding(x, params, patch_size)
    out = jax.block_until_ready(out)
    Hp, Wp = H // patch_size, W // patch_size
    assert out.shape == (B, Hp, Wp, embed_dim), out.shape
    assert bool(jnp.all(jnp.isfinite(out)))

    # reference: conv-as-einsum in full f32 precision (checks patch ordering too)
    xp = x.reshape(B, in_c, Hp, patch_size, Wp, patch_size)
    ref = jnp.einsum("bchpwq,ecpq->bhwe", xp, params["w"],
                     precision=lax.Precision.HIGHEST) + params["b"]
    assert bool(jnp.allclose(out, ref, atol=1e-3, rtol=1e-3))

    # fused-LayerNorm path (norm_layer=nn.LayerNorm)
    params_ln = dict(params, gamma=jnp.ones((embed_dim,), F32) * 1.1,
                     beta=jnp.full((embed_dim,), 0.05, F32))
    out_ln = jax.block_until_ready(patch_embedding(x, params_ln, patch_size))
    mu = jnp.mean(ref, -1, keepdims=True)
    var = jnp.mean((ref - mu) ** 2, -1, keepdims=True)
    ref_ln = (ref - mu) * lax.rsqrt(var + EPS) * params_ln["gamma"] + params_ln["beta"]
    assert bool(jnp.allclose(out_ln, ref_ln, atol=1e-3, rtol=1e-3))

    # non-divisible spatial dims: exercises the padding branch (30 -> 32)
    x2 = jax.random.normal(kx2, (1, in_c, 30, 30), F32)
    out2 = jax.block_until_ready(patch_embedding(x2, params, patch_size))
    assert out2.shape == (1, 8, 8, embed_dim), out2.shape
    assert bool(jnp.all(jnp.isfinite(out2)))

    print("KERNEL_OK")
</pallas_src>

<mosaic_0001>
module attributes {stable_mosaic.version = 11 : i64} {
  func.func @_patch_embed_kernel(%arg0: i32, %arg1: memref<256x48xf32, #tpu.memory_space<vmem>>, %arg2: memref<48x96xf32, #tpu.memory_space<vmem>>, %arg3: memref<1x96xf32, #tpu.memory_space<vmem>>, %arg4: memref<256x96xf32, #tpu.memory_space<vmem>>) attributes {dimension_semantics = [#tpu.dimension_semantics<parallel>], iteration_bounds = array<i64: 2>, scalar_prefetch = 0 : i64, scratch_operands = 0 : i64, tpu.core_type = #tpu.core_type<tc>, window_params = [{transform_indices = @transform_0, window_bounds = array<i64: 256, 48>}, {pipeline_mode = #tpu.pipeline_mode<synchronous>, transform_indices = @transform_1, window_bounds = array<i64: 48, 96>}, {pipeline_mode = #tpu.pipeline_mode<synchronous>, transform_indices = @transform_2, window_bounds = array<i64: 1, 96>}, {transform_indices = @transform_3, window_bounds = array<i64: 256, 96>}]} {
    %c0 = arith.constant 0 : index
    %c0_0 = arith.constant 0 : index
    %0 = vector.load %arg1[%c0, %c0_0] : memref<256x48xf32, #tpu.memory_space<vmem>>, vector<256x48xf32>
    %c0_1 = arith.constant 0 : index
    %c0_2 = arith.constant 0 : index
    %1 = vector.load %arg2[%c0_1, %c0_2] : memref<48x96xf32, #tpu.memory_space<vmem>>, vector<48x96xf32>
    %cst = arith.constant dense<0.000000e+00> : vector<256x96xf32>
    %2 = tpu.matmul %0, %1, %cst {dimension_numbers = #tpu.dot_dimension_numbers<[1], [0], [0], [1], [0, 0, 1, 1], [], []>, precision = #tpu.contract_precision<fp32>} : vector<256x48xf32>, vector<48x96xf32>, vector<256x96xf32> -> vector<256x96xf32>
    %c0_3 = arith.constant 0 : index
    %c0_4 = arith.constant 0 : index
    %3 = vector.load %arg3[%c0_3, %c0_4] : memref<1x96xf32, #tpu.memory_space<vmem>>, vector<1x96xf32>
    %4 = vector.broadcast %3 : vector<1x96xf32> to vector<256x96xf32>
    %5 = arith.addf %2, %4 : vector<256x96xf32>
    %c0_5 = arith.constant 0 : index
    %c0_6 = arith.constant 0 : index
    %6 = vector.load %arg4[%c0_5, %c0_6] : memref<256x96xf32, #tpu.memory_space<vmem>>, vector<256x96xf32>
    tpu.vector_store %arg4[%c0_5, %c0_6], %5 {strides = array<i32>} : memref<256x96xf32, #tpu.memory_space<vmem>>, vector<256x96xf32>,
    return
  }
  func.func @transform_0(%arg0: i32) -> (i32, i32) {
    %c0_i32 = arith.constant 0 : i32
    %c0_i32_0 = arith.constant 0 : i32
    return %arg0, %c0_i32 : i32, i32
  }
  func.func @transform_1(%arg0: i32) -> (i32, i32) {
    %c0_i32 = arith.constant 0 : i32
    %c0_i32_0 = arith.constant 0 : i32
    %c0_i32_1 = arith.constant 0 : i32
    return %c0_i32, %c0_i32_0 : i32, i32
  }
  func.func @transform_2(%arg0: i32) -> (i32, i32) {
    %c0_i32 = arith.constant 0 : i32
    %c0_i32_0 = arith.constant 0 : i32
    %c0_i32_1 = arith.constant 0 : i32
    return %c0_i32, %c0_i32_0 : i32, i32
  }
  func.func @transform_3(%arg0: i32) -> (i32, i32) {
    %c0_i32 = arith.constant 0 : i32
    %c0_i32_0 = arith.constant 0 : i32
    return %arg0, %c0_i32 : i32, i32
  }
}

</mosaic_0001>

<bundles_post_ra>
// kernel: tpu_custom_call.1
= control target key start
LH: loop header
LB: loop body
LE: loop exit
PB: predicated region body
PF: predicated region fallthrough
CT: control target
= control target key end

     0   :  { %s2885_s12 = smov 0   ;;  %s3982_s0 = inlined_call_operand.vmem [shape: f32[512,48], index: 0, kind: input, shape index: {}]   ;;  %s3983_s1 = inlined_call_operand.vmem [shape: f32[48,96], index: 1, kind: input, shape index: {}]   ;;  %s3984_s2 = inlined_call_operand.vmem [shape: f32[1,96], index: 2, kind: input, shape index: {}]   ;;  %s3985_s3 = inlined_call_operand.vmem [shape: f32[512,96], index: 3, kind: output, shape index: {}]  }
   0x1 LB: > { %s2249_s13 = sadd.s32 4294967295, %s2863_s12   ;;  %p2253_p0 = scmp.ge.s32.totalorder %s2863_s12, 1  ;;  %s2863_s12 = sphi %s2885_s12, %s13_s12  }
   0x2   : > { %p138_p1 = scmp.lt.s32.totalorder %s2863_s12, 3 }
   0x4   : > { %p139_p2 = pnand %p2253_p0, %p138_p1 }
   0x6   : > { %142 = sbr.rel (%p139_p2) target bundleno = 420 (0x1a4), region = 32 }
   0xb   : > { %v211_v0 = vld [vmem:[%s3983_s1 + $0x28] sm:$0xff]  ;;  %v210_v1 = vld [vmem:[%s3983_s1 + $0x20] sm:$0xff]  ;;  %v209_v2 = vld [vmem:[%s3983_s1 + $0x18] sm:$0xff]  ;;  %s2254_s20 = sshll.u32 %s2249_s13, 5  ;;  %vm219_vm0 = vcmask 392192   ;;  %vm2160_vm1 = vcmask 785408  }
   0xc   : > { %v2902_v3 = vand.u32 4294901760, %v211_v0  ;;  %v2904_v4 = vand.u32 4294901760, %v210_v1  ;;  %v2906_v5 = vand.u32 4294901760, %v209_v2  ;;  %v208_v6 = vld [vmem:[%s3983_s1 + $0x10] sm:$0xff]  ;;  %v207_v7 = vld [vmem:[%s3983_s1 + $0x8] sm:$0xff]  ;;  %v206_v8 = vld [vmem:[%s3983_s1] sm:$0xff] }
   0xd   : > { %v2917_v9 = vand.u32 4294901760, %v208_v6  ;;  %v2919_v10 = vand.u32 4294901760, %v207_v7  ;;  %v2921_v11 = vand.u32 4294901760, %v206_v8  ;;  %p163_p3 = scmp.lt.s32.totalorder %s2254_s20, 63 }
   0xe   : > { %2489 = vmatprep.subr.mxu0 %v2902_v3  ;;  %v2925_v12 = vsub.f32 %v211_v0, %v2902_v3  ;;  %v2928_v13 = vsub.f32 %v210_v1, %v2904_v4  ;;  %v2931_v14 = vsub.f32 %v209_v2, %v2906_v5 }
   0xf   : > { %2490 = vmatpush3.msra.mxu0 %v2902_v3  ;;  %v2935_v15 = vsub.f32 %v208_v6, %v2917_v9  ;;  %s4223_s20 = smov (!%p163_p3, %s2254_s20), 63  ;;  %v2940_v16 = vsub.f32 %v207_v7, %v2919_v10  ;;  %v2943_v17 = vsub.f32 %v206_v8, %v2921_v11 }
  0x10   : > { %2491 = vmatprep.subr.mxu0 %v2904_v4  ;;  %v2947_v18 = vand.u32 4294901760, %v2925_v12  ;;  %v2950_v19 = vand.u32 4294901760, %v2928_v13  ;;  %v2953_v20 = vand.u32 4294901760, %v2931_v14  ;;  %s2255_s27 = sshll.u32 %s4223_s20, 3 }
  0x11   : > { %2492 = vmatpush3.msra.mxu0 %v2904_v4  ;;  %v2957_v21 = vand.u32 4294901760, %v2935_v15  ;;  %v2961_v22 = vand.u32 4294901760, %v2940_v16  ;;  %v2964_v23 = vand.u32 4294901760, %v2943_v17  ;;  %s2978_s30 = scalar_lea.vmem %s3982_s0, %s2255_s27  ;;  %s3827_s8 = scalar_lea.vmem %s3985_s3, %s2255_s27 }
  0x12   : > { %v731_v24 = vsub.f32 %v2925_v12, %v2947_v18  ;;  %2493 = vmatprep.subr.mxu0 %v2906_v5  ;;  %v738_v25 = vsub.f32 %v2928_v13, %v2950_v19  ;;  %v745_v26 = vsub.f32 %v2931_v14, %v2953_v20  ;;  %v174_v28 = vld [vmem:[%s2978_s30] sm:$0xff]  ;;  %v175_v30 = vld [vmem:[%s2978_s30 + $0x8] sm:$0xff]  ;;  %v176_v32 = vld [vmem:[%s2978_s30 + $0x10] sm:$0xff] }
  0x13   : > { %2494 = vmatpush3.msra.mxu0 %v2906_v5  ;;  %v752_v27 = vsub.f32 %v2935_v15, %v2957_v21  ;;  %v759_v29 = vsub.f32 %v2940_v16, %v2961_v22  ;;  %v766_v31 = vsub.f32 %v2943_v17, %v2964_v23  ;;  %v221_v36 = vsel %vm219_vm0, %v174_v28, 0  ;;  %v177_v37 = vld [vmem:[%s2978_s30 + $0x18] sm:$0xff]  ;;  %v178_v38 = vld [vmem:[%s2978_s30 + $0x20] sm:$0xff]  ;;  %v179_v43 = vld [vmem:[%s2978_s30 + $0x28] sm:$0xff] }
  0x14   : > { %v732_v33 = vand.u32 4294901760, %v731_v24  ;;  %v739_v34 = vand.u32 4294901760, %v738_v25  ;;  %2495 = vmatprep.subr.mxu0 %v2917_v9  ;;  %v746_v35 = vand.u32 4294901760, %v745_v26  ;;  %v2995_v40 = vand.u32 4294901760, %v221_v36  ;;  %v180_v44 = vld [vmem:[%s2978_s30 + $0x30] sm:$0xff]  ;;  %v181_v53 = vld [vmem:[%s2978_s30 + $0x38] sm:$0xff] }
  0x15   : > { %2496 = vmatpush3.msra.mxu0 %v2917_v9  ;;  %v753_v39 = vand.u32 4294901760, %v752_v27  ;;  %v760_v41 = vand.u32 4294901760, %v759_v29  ;;  %v224_v42 = vsel %vm219_vm0, %v175_v30, 0  ;;  %v3003_v46 = vand.u32 4294901760, %v766_v31  ;;  %v182_v28 = vld [vmem:[%s2978_s30 + $0x40] sm:$0xff] }
  0x16   : > { %4053 = vst [vmem:[#allocation2_spill] sm:$0xff] %v2995_v40  ;;  %2549 = vmatprep.subr.mxu1 %v732_v33  ;;  %2497 = vmatprep.subr.mxu0 %v2919_v10  ;;  %v3001_v45 = vand.u32 4294901760, %v224_v42  ;;  %v227_v47 = vsel %vm219_vm0, %v176_v32, 0  ;;  %v230_v48 = vsel %vm219_vm0, %v177_v37, 0  ;;  %v3009_v49 = vsub.f32 %v221_v36, %v2995_v40  ;;  %v183_v37 = vld [vmem:[%s2978_s30 + $0x48] sm:$0xff] }
  0x17   : > { %2550 = vmatpush3.msra.mxu1 %v732_v33  ;;  %2498 = vmatpush3.msra.mxu0 %v2919_v10  ;;  %v3011_v50 = vand.u32 4294901760, %v227_v47  ;;  %v3013_v51 = vand.u32 4294901760, %v230_v48  ;;  %v233_v52 = vsel %vm219_vm0, %v178_v38, 0  ;;  %v236_v56 = vsel %vm219_vm0, %v179_v43, 0  ;;  %v184_v38 = vld [vmem:[%s2978_s30 + $0x50] sm:$0xff] }
  0x18   : > { %4054 = vst [vmem:[#allocation3_spill] sm:$0xff] %v3001_v45  ;;  %2551 = vmatprep.subr.mxu1 %v739_v34  ;;  %2499 = vmatprep.subr.mxu0 %v2921_v11  ;;  %v3019_v54 = vsub.f32 %v224_v42, %v3001_v45  ;;  %v3021_v55 = vand.u32 4294901760, %v233_v52  ;;  %v239_v57 = vsel %vm219_vm0, %v180_v44, 0  ;;  %v3997_v58 = vand.u32 4294901760, %v3009_v49 }
  0x19   : > { %4055 = vst [vmem:[#allocation4_spill] sm:$0xff] %v3011_v50  ;;  %4056 = vst [vmem:[#allocation5_spill] sm:$0xff] %v3013_v51  ;;  %2552 = vmatpush3.msra.mxu1 %v739_v34  ;;  %2500 = vmatpush3.msra.mxu0 %v2921_v11  ;;  %v3028_v59 = vsub.f32 %v227_v47, %v3011_v50  ;;  %v3031_v60 = vsub.f32 %v230_v48, %v3013_v51  ;;  %v3033_v61 = vand.u32 4294901760, %v236_v56 }
  0x1a   : > { %4057 = vst [vmem:[#allocation6_spill] sm:$0xff] %v3021_v55  ;;  %2553 = vmatprep.subr.mxu1 %v746_v35  ;;  %v3995_v62 = vand.u32 4294901760, %v3019_v54  ;;  %2609 = vmatprep.subr.mxu0 %v2925_v12  ;;  %v3038_v63 = vsub.f32 %v233_v52, %v3021_v55  ;;  %v3040_v0 = vand.u32 4294901760, %v239_v57  ;;  %v242_v1 = vsel %vm219_vm0, %v181_v53, 0 }
  0x1b   : > { %4058 = vst [vmem:[#allocation7_spill] sm:$0xff] %v3033_v61  ;;  %2554 = vmatpush3.msra.mxu1 %v746_v35  ;;  %v390_v2 = vsub.f32 %v3009_v49, %v3997_v58  ;;  %2561 = vmatprep.mubr.f32.mxu1 %v2995_v40  ;;  %v3994_v6 = vand.u32 4294901760, %v3028_v59  ;;  %v3991_v7 = vand.u32 4294901760, %v3031_v60  ;;  %v3050_v8 = vsub.f32 %v236_v56, %v3033_v61  ;;  %v187_v56 = vld [vmem:[%s2978_s30 + $0x68] sm:$0xff]  ;;  %v194_v58 = vld [vmem:[%s2978_s30 + $0xa0] sm:$0xff] }
  0x1c   : > { %4059 = vst [vmem:[#allocation8_spill] sm:$0xff] %v3040_v0  ;;  %2555 = vmatprep.subr.mxu1 %v753_v39  ;;  %v400_v24 = vsub.f32 %v3019_v54, %v3995_v62  ;;  %v3990_v25 = vand.u32 4294901760, %v3038_v63  ;;  %v3057_v26 = vsub.f32 %v239_v57, %v3040_v0  ;;  %v3059_v27 = vand.u32 4294901760, %v242_v1 }
  0x1d   : > { %2556 = vmatpush3.msra.mxu1 %v753_v39  ;;  %v391_v29 = vand.u32 4294901760, %v390_v2  ;;  %v410_v30 = vsub.f32 %v3028_v59, %v3994_v6  ;;  %v420_v31 = vsub.f32 %v3031_v60, %v3991_v7  ;;  %v3989_v32 = vand.u32 4294901760, %v3050_v8  ;;  %v185_v39 = vld [vmem:[%s2978_s30 + $0x58] sm:$0xff] }
  0x1e   : > { %4060 = vst [vmem:[#allocation9_spill] sm:$0xff] %v3059_v27  ;;  %2557 = vmatprep.subr.mxu1 %v760_v41  ;;  %v401_v33 = vand.u32 4294901760, %v400_v24  ;;  %v430_v34 = vsub.f32 %v3038_v63, %v3990_v25  ;;  %v3988_v35 = vand.u32 4294901760, %v3057_v26  ;;  %v3074_v36 = vsub.f32 %v242_v1, %v3059_v27  ;;  %v193_v6 = vld [vmem:[%s2978_s30 + $0x98] sm:$0xff] }
  0x1f   : > { %2501 = vmatprep.mubr.f32.mxu0 %v391_v29  ;;  %2558 = vmatpush3.msra.mxu1 %v760_v41  ;;  %v411_v42 = vand.u32 4294901760, %v410_v30  ;;  %v440_v43 = vsub.f32 %v3050_v8, %v3989_v32  ;;  %v245_v44 = vsel %vm219_vm0, %v182_v28, 0  ;;  %v421_v47 = vand.u32 4294901760, %v420_v31  ;;  %v186_v41 = vld [vmem:[%s2978_s30 + $0x60] sm:$0xff] }
  0x20   : > { %2502 = vmatmul.mubr.f32.vlgmr.msra.gmra.mxu0 %v401_v33  ;;  %2559 = vmatprep.subr.mxu1 %v3003_v46  ;;  %v450_v48 = vsub.f32 %v3057_v26, %v3988_v35  ;;  %v3986_v52 = vand.u32 4294901760, %v3074_v36  ;;  %v3088_v53 = vand.u32 4294901760, %v245_v44  ;;  %v431_v57 = vand.u32 4294901760, %v430_v34  ;;  %v190_v35 = vld [vmem:[%s2978_s30 + $0x80] sm:$0xff] }
  0x21   : > { %2560 = vmatpush3.msra.mxu1 %v3003_v46  ;;  %2610 = vmatpush3.msra.mxu0 %v2925_v12  ;;  %v248_v1 = vsel %vm219_vm0, %v183_v37, 0  ;;  %v251_v2 = vsel %vm219_vm0, %v184_v38, 0  ;;  %v254_v24 = vsel %vm219_vm0, %v185_v39, 0  ;;  %v441_v28 = vand.u32 4294901760, %v440_v43  ;;  %v188_v46 = vld [vmem:[%s2978_s30 + $0x70] sm:$0xff] }
  0x22   : > { %4061 = vst [vmem:[#allocation10_spill] sm:$0xff] %v3088_v53  ;;  %2504 = vmatprep.mubr.f32.mxu0 %v411_v42  ;;  %2562 = vmatmul.mubr.f32.vlgmr.msra.gmra.mxu1 %v3001_v45  ;;  %v451_v29 = vand.u32 4294901760, %v450_v48  ;;  %v3099_v30 = vsub.f32 %v245_v44, %v3088_v53  ;;  %v3101_v31 = vand.u32 4294901760, %v248_v1  ;;  %v3106_v12 = vand.u32 4294901760, %v251_v2  ;;  %v189_v44 = vld [vmem:[%s2978_s30 + $0x78] sm:$0xff] }
  0x23   : > { %2669 = vmatprep.subr.mxu1 %v2902_v3  ;;  %2564 = vmatprep.mubr.f32.mxu1 %v3011_v50  ;;  %v3108_v33 = vand.u32 4294901760, %v254_v24  ;;  %v257_v34 = vsel %vm219_vm0, %v186_v41, 0  ;;  %v260_v37 = vsel %vm219_vm0, %v187_v56, 0  ;;  %v460_v38 = vsub.f32 %v3074_v36, %v3986_v52 }
  0x24   : > { %4062 = vst [vmem:[#allocation11_spill] sm:$0xff] %v3101_v31  ;;  %4063 = vst [vmem:[#allocation12_spill] sm:$0xff] %v3106_v12  ;;  %2505 = vmatmul.mubr.f32.gmra.mxu0 %v421_v47  ;;  %2670 = vmatpush3.msra.mxu1 %v2902_v3  ;;  %v3987_v39 = vand.u32 4294901760, %v3099_v30  ;;  %v3118_v42 = vsub.f32 %v248_v1, %v3101_v31  ;;  %v3120_v43 = vand.u32 4294901760, %v257_v34  ;;  %v3130_v41 = vand.u32 4294901760, %v260_v37 }
  0x25   : > { %4064 = vst [vmem:[#allocation13_spill] sm:$0xff] %v3108_v33  ;;  %2507 = vmatprep.mubr.f32.mxu0 %v431_v57  ;;  %2611 = vmatprep.subr.mxu0 %v2928_v13  ;;  %v3125_v48 = vsub.f32 %v251_v2, %v3106_v12  ;;  %v3128_v47 = vsub.f32 %v254_v24, %v3108_v33  ;;  %v263_v56 = vsel %vm219_vm0, %v188_v46, 0 }
  0x26   : > { %4065 = vst [vmem:[#allocation14_spill] sm:$0xff] %v3120_v43  ;;  %4066 = vst [vmem:[#allocation15_spill] sm:$0xff] %v3130_v41  ;;  %2565 = vmatmul.mubr.f32.gmra.mxu1 %v3013_v51  ;;  %2612 = vmatpush3.msra.mxu0 %v2928_v13  ;;  %v470_v57 = vsub.f32 %v3099_v30, %v3987_v39  ;;  %v3993_v1 = vand.u32 4294901760, %v3118_v42  ;;  %v3140_v2 = vsub.f32 %v257_v34, %v3120_v43 }
  0x27   : > { %v3142_v52 = vand.u32 4294901760, %v263_v56  ;;  %2567 = vmatprep.mubr.f32.mxu1 %v3021_v55  ;;  %2671 = vmatprep.subr.mxu1 %v2904_v4  ;;  %v3992_v24 = vand.u32 4294901760, %v3125_v48  ;;  %v3996_v13 = vand.u32 4294901760, %v3128_v47  ;;  %v3149_v46 = vsub.f32 %v260_v37, %v3130_v41 }
  0x28   : > { %v266_v39 = vsel %vm219_vm0, %v189_v44, 0  ;;  %2508 = vmatmul.mubr.f32.gmra.mxu0 %v441_v28  ;;  %v461_v34 = vand.u32 4294901760, %v460_v38  ;;  %2672 = vmatpush3.msra.mxu1 %v2904_v4  ;;  %v480_v32 = vsub.f32 %v3118_v42, %v3993_v1  ;;  %v3998_v25 = vand.u32 4294901760, %v3140_v2  ;;  %v191_v44 = vld [vmem:[%s2978_s30 + $0x88] sm:$0xff] }
  0x29   : > { %4067 = vst [vmem:[#allocation16_spill] sm:$0xff] %v3142_v52  ;;  %2510 = vmatprep.mubr.f32.mxu0 %v451_v29  ;;  %v471_v7 = vand.u32 4294901760, %v470_v57  ;;  %v490_v37 = vsub.f32 %v3125_v48, %v3992_v24  ;;  %2613 = vmatprep.subr.mxu0 %v2931_v14  ;;  %v3163_v28 = vsub.f32 %v263_v56, %v3142_v52  ;;  %v3165_v38 = vand.u32 4294901760, %v266_v39  ;;  %v192_v57 = vld [vmem:[%s2978_s30 + $0x90] sm:$0xff] }
  0x2a   : > { %2568 = vmatmul.mubr.f32.gmra.mxu1 %v3033_v61  ;;  %2614 = vmatpush3.msra.mxu0 %v2931_v14  ;;  %v269_v29 = vsel %vm219_vm0, %v190_v35, 0  ;;  %v500_v24 = vsub.f32 %v3128_v47, %v3996_v13  ;;  %v510_v56 = vsub.f32 %v3140_v2, %v3998_v25  ;;  %v481_v14 = vand.u32 4294901760, %v480_v32 }
  0x2b   : > { %4068 = vst [vmem:[#allocation17_spill] sm:$0xff] %v3165_v38  ;;  %2570 = vmatprep.mubr.f32.mxu1 %v3040_v0  ;;  %2673 = vmatprep.subr.mxu1 %v2906_v5  ;;  %v3184_v35 = vsub.f32 %v266_v39, %v3165_v38  ;;  %v3186_v62 = vand.u32 4294901760, %v269_v29  ;;  %v272_v13 = vsel %vm219_vm0, %v191_v44, 0  ;;  %v491_v25 = vand.u32 4294901760, %v490_v37 }
  0x2c   : > { %2511 = vmatmul.mubr.f32.gmra.mxu0 %v461_v34  ;;  %2674 = vmatpush3.msra.mxu1 %v2906_v5  ;;  %v3191_v0 = vand.u32 4294901760, %v272_v13  ;;  %v275_v32 = vsel %vm219_vm0, %v192_v57, 0  ;;  %v195_v34 = vld [vmem:[%s2978_s30 + $0xa8] sm:$0xff]  ;;  %v501_v37 = vand.u32 4294901760, %v500_v24  ;;  %v511_v1 = vand.u32 4294901760, %v510_v56 }
  0x2d   : > { %4069 = vst [vmem:[#allocation18_spill] sm:$0xff] %v3186_v62  ;;  %2513 = vmatprep.mubr.f32.mxu0 %v471_v7  ;;  %2615 = vmatprep.subr.mxu0 %v2935_v15  ;;  %v3198_v39 = vsub.f32 %v269_v29, %v3186_v62  ;;  %v3201_v44 = vand.u32 4294901760, %v275_v32  ;;  %v278_v7 = vsel %vm219_vm0, %v193_v6, 0  ;;  %v4072_v61 = vand.u32 4294901760, %v3149_v46 }
  0x2e   : > { %4070 = vst [vmem:[#allocation19_spill] sm:$0xff] %v3191_v0  ;;  %2571 = vmatmul.mubr.f32.gmra.mxu1 %v3059_v27  ;;  %2616 = vmatpush3.msra.mxu0 %v2935_v15  ;;  %v281_v29 = vsel %vm219_vm0, %v194_v58, 0  ;;  %v196_v27 = vld [vmem:[%s2978_s30 + $0xb0] sm:$0xff]  ;;  %v3213_v55 = vsub.f32 %v272_v13, %v3191_v0  ;;  %v3215_v6 = vand.u32 4294901760, %v278_v7  ;;  %v284_v24 = vsel %vm219_vm0, %v195_v34, 0  ;;  %v197_v13 = vld [vmem:[%s2978_s30 + $0xb8] sm:$0xff] }
  0x2f   : > { %4071 = vst [vmem:[#allocation20_spill] sm:$0xff] %v3201_v44  ;;  %2573 = vmatprep.mubr.f32.mxu1 %v3088_v53  ;;  %v520_v57 = vsub.f32 %v3149_v46, %v4072_v61  ;;  %2675 = vmatprep.subr.mxu1 %v2917_v9  ;;  %v4074_v61 = vand.u32 4294901760, %v3163_v28  ;;  %v3226_v15 = vand.u32 4294901760, %v281_v29  ;;  %v287_v34 = vsel %vm219_vm0, %v196_v27, 0 }
  0x30   : > { %2514 = vmatmul.mubr.f32.gmra.mxu0 %v481_v14  ;;  %4073 = vst [vmem:[#allocation21_spill] sm:$0xff] %v3215_v6  ;;  %2676 = vmatpush3.msra.mxu1 %v2917_v9  ;;  %v3224_v14 = vsub.f32 %v275_v32, %v3201_v44  ;;  %v3236_v58 = vand.u32 4294901760, %v287_v34  ;;  %v198_v32 = vld [vmem:[%s2978_s30 + $0xc0] sm:$0xff]  ;;  %v4077_v53 = vand.u32 4294901760, %v3184_v35  ;;  %v4021_v27 = vand.u32 4294901760, %v3213_v55 }
  0x31   : > { %2516 = vmatprep.mubr.f32.mxu0 %v491_v25  ;;  %v530_v56 = vsub.f32 %v3163_v28, %v4074_v61  ;;  %2617 = vmatprep.subr.mxu0 %v2940_v16  ;;  %v521_v25 = vand.u32 4294901760, %v520_v57  ;;  %v3234_v61 = vand.u32 4294901760, %v284_v24  ;;  %v290_v57 = vsel %vm219_vm0, %v197_v13, 0  ;;  %v199_v13 = vld [vmem:[%s2978_s30 + $0xc8] sm:$0xff] }
  0x32   : > { %4075 = vst [vmem:[#allocation22_spill] sm:$0xff] %v3224_v14  ;;  %2574 = vmatmul.mubr.f32.gmra.mxu1 %v3101_v31  ;;  %2618 = vmatpush3.msra.mxu0 %v2940_v16  ;;  %v540_v31 = vsub.f32 %v3184_v35, %v4077_v53  ;;  %v3245_v16 = vsub.f32 %v278_v7, %v3215_v6  ;;  %v4079_v51 = vand.u32 4294901760, %v3198_v39  ;;  %v293_v7 = vsel %vm219_vm0, %v198_v32, 0  ;;  %v201_v32 = vld [vmem:[%s2978_s30 + $0xd8] sm:$0xff] }
  0x33   : > { %2576 = vmatprep.mubr.f32.mxu1 %v3106_v12  ;;  %4076 = vst [vmem:[#allocation23_spill] sm:$0xff] %v3234_v61  ;;  %2677 = vmatprep.subr.mxu1 %v2919_v10  ;;  %v531_v12 = vand.u32 4294901760, %v530_v56  ;;  %v3254_v53 = vsub.f32 %v281_v29, %v3226_v15  ;;  %v3268_v56 = vand.u32 4294901760, %v290_v57  ;;  %v200_v29 = vld [vmem:[%s2978_s30 + $0xd0] sm:$0xff] }
  0x34   : > { %2517 = vmatmul.mubr.f32.gmra.mxu0 %v501_v37  ;;  %4078 = vst [vmem:[#allocation24_spill] sm:$0xff] %v3245_v16  ;;  %2678 = vmatpush3.msra.mxu1 %v2919_v10  ;;  %v550_v37 = vsub.f32 %v3198_v39, %v4079_v51  ;;  %v3266_v51 = vsub.f32 %v287_v34, %v3236_v58  ;;  %v541_v50 = vand.u32 4294901760, %v540_v31  ;;  %v4082_v34 = vand.u32 4294901760, %v3224_v14 }
  0x35   : > { %2519 = vmatprep.mubr.f32.mxu0 %v511_v1  ;;  %4080 = vst [vmem:[#allocation25_spill] sm:$0xff] %v3254_v53  ;;  %2619 = vmatprep.subr.mxu0 %v2943_v17  ;;  %v3263_v1 = vsub.f32 %v284_v24, %v3234_v61  ;;  %v296_v31 = vsel %vm219_vm0, %v199_v13, 0  ;;  %v202_v13 = vld [vmem:[%s2978_s30 + $0xe0] sm:$0xff] }
  0x36   : > { %2577 = vmatmul.mubr.f32.gmra.mxu1 %v3108_v33  ;;  %2620 = vmatpush3.msra.mxu0 %v2943_v17  ;;  %v560_v17 = vsub.f32 %v3213_v55, %v4021_v27  ;;  %v551_v24 = vand.u32 4294901760, %v550_v37  ;;  %v570_v33 = vsub.f32 %v3224_v14, %v4082_v34  ;;  %v299_v27 = vsel %vm219_vm0, %v200_v29, 0 }
  0x37   : > { %2579 = vmatprep.mubr.f32.mxu1 %v3120_v43  ;;  %4081 = vst [vmem:[#allocation26_spill] sm:$0xff] %v3263_v1  ;;  %2679 = vmatprep.subr.mxu1 %v2921_v11  ;;  %v3276_v43 = vand.u32 4294901760, %v293_v7  ;;  %v3293_v34 = vsub.f32 %v290_v57, %v3268_v56  ;;  %v4084_v37 = vand.u32 4294901760, %v3254_v53  ;;  %v3307_v40 = vand.u32 4294901760, %v299_v27 }
  0x38   : > { %2520 = vmatmul.mubr.f32.gmra.mxu0 %v521_v25  ;;  %2680 = vmatpush3.msra.mxu1 %v2921_v11  ;;  %v561_v25 = vand.u32 4294901760, %v560_v17  ;;  %v305_v17 = vsel %vm219_vm0, %v202_v13, 0 }
  0x39   : > { %2522 = vmatprep.mubr.f32.mxu0 %v531_v12  ;;  %2729 = vmatprep.subr.mxu0 %v2947_v18  ;;  %v3300_v45 = vsub.f32 %v293_v7, %v3276_v43  ;;  %v571_v12 = vand.u32 4294901760, %v570_v33  ;;  %v590_v57 = vsub.f32 %v3254_v53, %v4084_v37  ;;  %v4085_v7 = vand.u32 4294901760, %v3263_v1 }
  0x3a   : > { %2580 = vmatmul.mubr.f32.gmra.mxu1 %v3130_v41  ;;  %2789 = vmatprep.subr.mxu1 %v2902_v3  ;;  %v4083_v41 = vand.u32 4294901760, %v3245_v16  ;;  %v4086_v33 = vand.u32 4294901760, %v3266_v51  ;;  %v4046_v53 = vand.u32 4294901760, %v3293_v34 }
  0x3b   : > { %2582 = vmatprep.mubr.f32.mxu1 %v3142_v52  ;;  %v3302_v52 = vand.u32 4294901760, %v296_v31  ;;  %v591_v14 = vand.u32 4294901760, %v590_v57 }
  0x3c   : > { %2523 = vmatmul.mubr.f32.gmra.mxu0 %v541_v50  ;;  %v580_v29 = vsub.f32 %v3245_v16, %v4083_v41  ;;  %v302_v50 = vsel %vm219_vm0, %v201_v32, 0  ;;  %v203_v41 = vld [vmem:[%s2978_s30 + $0xe8] sm:$0xff]  ;;  %v610_v37 = vsub.f32 %v3266_v51, %v4086_v33  ;;  %v204_v16 = vld [vmem:[%s2978_s30 + $0xf0] sm:$0xff] }
  0x3d   : > { %2525 = vmatprep.mubr.f32.mxu0 %v551_v24  ;;  %v600_v24 = vsub.f32 %v3263_v1, %v4085_v7  ;;  %v3324_v13 = vsub.f32 %v296_v31, %v3302_v52  ;;  %v3329_v7 = vsub.f32 %v299_v27, %v3307_v40  ;;  %v3331_v1 = vand.u32 4294901760, %v305_v17 }
  0x3e   : > { %2583 = vmatmul.mubr.f32.gmra.mxu1 %v3165_v38  ;;  %v581_v32 = vand.u32 4294901760, %v580_v29  ;;  %v308_v33 = vsel %vm219_vm0, %v203_v41, 0  ;;  %v205_v29 = vld [vmem:[%s2978_s30 + $0xf8] sm:$0xff]  ;;  %v611_v38 = vand.u32 4294901760, %v610_v37  ;;  %v4087_v27 = vand.u32 4294901760, %v3300_v45 }
  0x3f   : > { %2585 = vmatprep.mubr.f32.mxu1 %v3186_v62  ;;  %v3326_v62 = vand.u32 4294901760, %v302_v50  ;;  %v601_v31 = vand.u32 4294901760, %v600_v24  ;;  %v4049_v41 = vand.u32 4294901760, %v3324_v13  ;;  %v3352_v37 = vsub.f32 %v305_v17, %v3331_v1 }
  0x40   : > { %2526 = vmatmul.mubr.f32.gmra.mxu0 %v561_v25  ;;  %v311_v25 = vsel %vm219_vm0, %v204_v16, 0  ;;  %v630_v57 = vsub.f32 %v3300_v45, %v4087_v27  ;;  %v3348_v16 = vand.u32 4294901760, %v308_v33 }
  0x41   : > { %2528 = vmatprep.mubr.f32.mxu0 %v571_v12  ;;  %v620_v12 = vsub.f32 %v3293_v34, %v4046_v53 }
  0x42   : > { %2586 = vmatmul.mubr.f32.gmra.mxu1 %v3191_v0  ;;  %v3346_v0 = vsub.f32 %v302_v50, %v3326_v62  ;;  %v640_v50 = vsub.f32 %v3324_v13, %v4049_v41  ;;  %v3364_v53 = vsub.f32 %v308_v33, %v3348_v16  ;;  %v631_v24 = vand.u32 4294901760, %v630_v57 }
  0x43   : > { %2588 = vmatprep.mubr.f32.mxu1 %v3201_v44  ;;  %v3354_v44 = vand.u32 4294901760, %v311_v25  ;;  %v621_v27 = vand.u32 4294901760, %v620_v12  ;;  %v4052_v12 = vand.u32 4294901760, %v3352_v37 }
  0x44   : > { %2529 = vmatmul.mubr.f32.gmra.mxu0 %v581_v32  ;;  %v314_v32 = vsel %vm219_vm0, %v205_v29, 0  ;;  %v4088_v29 = vand.u32 4294901760, %v3329_v7  ;;  %v641_v33 = vand.u32 4294901760, %v640_v50  ;;  %v679_v57 = vand.u32 4294901760, %v3364_v53 }
  0x45   : > { %2531 = vmatprep.mubr.f32.mxu0 %v591_v14  ;;  %v659_v14 = vand.u32 4294901760, %v3346_v0  ;;  %v3366_v17 = vand.u32 4294901760, %v314_v32 }
  0x46   : > { %2589 = vmatmul.mubr.f32.gmra.mxu1 %v3215_v6  ;;  %v650_v6 = vsub.f32 %v3329_v7, %v4088_v29  ;;  %v680_v50 = vsub.f32 %v3364_v53, %v679_v57 }
  0x47   : > { %2591 = vmatprep.mubr.f32.mxu1 %v3226_v15  ;;  %v3382_v41 = vsub.f32 %v314_v32, %v3366_v17 }
  0x48   : > { %2532 = vmatmul.mubr.f32.gmra.mxu0 %v601_v31  ;;  %v3373_v31 = vsub.f32 %v311_v25, %v3354_v44  ;;  %v651_v29 = vand.u32 4294901760, %v650_v6  ;;  %v670_v25 = vsub.f32 %v3352_v37, %v4052_v12  ;;  %v681_v12 = vand.u32 4294901760, %v680_v50  ;;  %v4135_v50 = vld [vmem:[#allocation16_spill] sm:$0xff] }
  0x49   : > { %2534 = vmatprep.mubr.f32.mxu0 %v611_v38  ;;  %v660_v38 = vsub.f32 %v3346_v0, %v659_v14  ;;  %v699_v32 = vand.u32 4294901760, %v3382_v41 }
  0x4a   : > { %2592 = vmatmul.mubr.f32.gmra.mxu1 %v3234_v61  ;;  %v689_v61 = vand.u32 4294901760, %v3373_v31  ;;  %v671_v6 = vand.u32 4294901760, %v670_v25  ;;  %v4089_v25 = vand.u32 4294901760, %v3009_v49 }
  0x4b   : > { %2594 = vmatprep.mubr.f32.mxu1 %v3236_v58 }
  0x4c   : > { %2535 = vmatmul.mubr.f32.gmra.mxu0 %v621_v27  ;;  %v661_v27 = vand.u32 4294901760, %v660_v38 }
  0x4d   : > { %2537 = vmatprep.mubr.f32.mxu0 %v631_v24  ;;  %v690_v24 = vsub.f32 %v3373_v31, %v689_v61 }
  0x4e   : > { %2595 = vmatmul.mubr.f32.gmra.mxu1 %v3268_v56 }
  0x4f   : > { %2597 = vmatprep.mubr.f32.mxu1 %v3276_v43  ;;  %v691_v38 = vand.u32 4294901760, %v690_v24  ;;  %v4138_v24 = vld [vmem:[#allocation19_spill] sm:$0xff] }
  0x50   : > { %2538 = vmatmul.mubr.f32.gmra.mxu0 %v641_v33  ;;  %v700_v33 = vsub.f32 %v3382_v41, %v699_v32 }
  0x51   : > { %2540 = vmatprep.mubr.f32.mxu0 %v651_v29 }
  0x52   : > { %2598 = vmatmul.mubr.f32.gmra.mxu1 %v3302_v52  ;;  %v701_v29 = vand.u32 4294901760, %v700_v33  ;;  %v4139_v33 = vld [vmem:[#allocation20_spill] sm:$0xff] }
  0x53   : > { %2600 = vmatprep.mubr.f32.mxu1 %v3307_v40 }
  0x54   : > { %2541 = vmatmul.mubr.f32.gmra.mxu0 %v661_v27  ;;  %v4091_v27 = vand.u32 4294901760, %v3028_v59 }
  0x55   : > { %2543 = vmatprep.mubr.f32.mxu0 %v671_v6  ;;  %v4137_v6 = vld [vmem:[#allocation18_spill] sm:$0xff] }
  0x56   : > { %2601 = vmatmul.mubr.f32.gmra.mxu1 %v3326_v62 }
  0x57   : > { %2603 = vmatprep.mubr.f32.mxu1 %v3331_v1 }
  0x58   : > { %2544 = vmatmul.mubr.f32.gmra.mxu0 %v681_v12  ;;  %v4090_v12 = vand.u32 4294901760, %v3019_v54 }
  0x59   : > { %2546 = vmatprep.mubr.f32.mxu0 %v691_v38  ;;  %v4140_v38 = vld [vmem:[#allocation21_spill] sm:$0xff] }
  0x5a   : > { %2604 = vmatmul.mubr.f32.gmra.mxu1 %v3348_v16 }
  0x5b   : > { %2606 = vmatprep.mubr.f32.mxu1 %v3354_v44 }
  0x5c   : > { %2547 = vmatmul.mubr.f32.gmra.mxu0 %v701_v29  ;;  %v4141_v29 = vld [vmem:[#allocation23_spill] sm:$0xff] }
  0x5d   : > { %2621 = vmatprep.mubr.f32.mxu0 %v3009_v49  ;;  %v4093_v49 = vand.u32 4294901760, %v3038_v63 }
  0x5e   : > { %2607 = vmatmul.mubr.f32.gmra.mxu1 %v3366_v17 }
  0x5f   : > { %2681 = vmatprep.mubr.f32.mxu1 %v4089_v25 }
  0x60   : > { %2622 = vmatmul.mubr.f32.vlgmr.msra.gmra.mxu0 %v3019_v54  ;;  %v4103_v54 = vand.u32 4294901760, %v3163_v28 }
  0x61   : > { %2730 = vmatpush3.msra.mxu0 %v2947_v18  ;;  %2624 = vmatprep.mubr.f32.mxu0 %v3028_v59  ;;  %v4092_v18 = vand.u32 4294901760, %v3031_v60  ;;  %v4105_v59 = vand.u32 4294901760, %v3198_v39 }
  0x62   : > { %2682 = vmatmul.mubr.f32.vlgmr.msra.gmra.mxu1 %v4090_v12  ;;  %2731 = vmatprep.subr.mxu0 %v2950_v19 }
  0x63   : > { %2790 = vmatpush3.msra.mxu1 %v2902_v3  ;;  %2684 = vmatprep.mubr.f32.mxu1 %v4091_v27  ;;  %v4094_v3 = vand.u32 4294901760, %v3050_v8 }
  0x64   : > { %2625 = vmatmul.mubr.f32.gmra.mxu0 %v3031_v60  ;;  %2791 = vmatprep.subr.mxu1 %v2904_v4  ;;  %v4107_v60 = vand.u32 4294901760, %v3213_v55 }
  0x65   : > { %2627 = vmatprep.mubr.f32.mxu0 %v3038_v63  ;;  %2732 = vmatpush3.msra.mxu0 %v2950_v19  ;;  %v4095_v19 = vand.u32 4294901760, %v3057_v26 }
  0x66   : > { %2685 = vmatmul.mubr.f32.gmra.mxu1 %v4092_v18  ;;  %2733 = vmatprep.subr.mxu0 %v2953_v20 }
  0x67   : > { %2687 = vmatprep.mubr.f32.mxu1 %v4093_v49  ;;  %2792 = vmatpush3.msra.mxu1 %v2904_v4  ;;  %v4096_v4 = vand.u32 4294901760, %v3074_v36 }
  0x68   : > { %2628 = vmatmul.mubr.f32.gmra.mxu0 %v3050_v8  ;;  %2793 = vmatprep.subr.mxu1 %v2906_v5  ;;  %v4109_v8 = vld [vmem:[#allocation24_spill] sm:$0xff] }
  0x69   : > { %2630 = vmatprep.mubr.f32.mxu0 %v3057_v26  ;;  %2734 = vmatpush3.msra.mxu0 %v2953_v20  ;;  %v4097_v20 = vand.u32 4294901760, %v3099_v30  ;;  %v4110_v26 = vld [vmem:[#allocation25_spill] sm:$0xff] }
  0x6a   : > { %2688 = vmatmul.mubr.f32.gmra.mxu1 %v4094_v3  ;;  %2735 = vmatprep.subr.mxu0 %v2957_v21 }
  0x6b   : > { %2690 = vmatprep.mubr.f32.mxu1 %v4095_v19  ;;  %2794 = vmatpush3.msra.mxu1 %v2906_v5  ;;  %v4098_v5 = vand.u32 4294901760, %v3118_v42 }
  0x6c   : > { %2631 = vmatmul.mubr.f32.gmra.mxu0 %v3074_v36  ;;  %2795 = vmatprep.subr.mxu1 %v2917_v9  ;;  %v4111_v36 = vand.u32 4294901760, %v4109_v8 }
  0x6d   : > { %2633 = vmatprep.mubr.f32.mxu0 %v3099_v30  ;;  %2736 = vmatpush3.msra.mxu0 %v2957_v21  ;;  %v4099_v21 = vand.u32 4294901760, %v3125_v48  ;;  %v4112_v30 = vand.u32 4294901760, %v4110_v26 }
  0x6e   : > { %2691 = vmatmul.mubr.f32.gmra.mxu1 %v4096_v4  ;;  %2737 = vmatprep.subr.mxu0 %v2961_v22 }
  0x6f   : > { %2693 = vmatprep.mubr.f32.mxu1 %v4097_v20  ;;  %2796 = vmatpush3.msra.mxu1 %v2917_v9  ;;  %v4100_v9 = vand.u32 4294901760, %v3128_v47 }
  0x70   : > { %2634 = vmatmul.mubr.f32.gmra.mxu0 %v3118_v42  ;;  %2797 = vmatprep.subr.mxu1 %v2919_v10  ;;  %v4113_v42 = vld [vmem:[#allocation26_spill] sm:$0xff] }
  0x71   : > { %2636 = vmatprep.mubr.f32.mxu0 %v3125_v48  ;;  %2738 = vmatpush3.msra.mxu0 %v2961_v22  ;;  %v4101_v22 = vand.u32 4294901760, %v3140_v2  ;;  %v4115_v48 = vand.u32 4294901760, %v3266_v51 }
  0x72   : > { %2694 = vmatmul.mubr.f32.gmra.mxu1 %v4098_v5  ;;  %2739 = vmatprep.subr.mxu0 %v2964_v23 }
  0x73   : > { %2696 = vmatprep.mubr.f32.mxu1 %v4099_v21  ;;  %2798 = vmatpush3.msra.mxu1 %v2919_v10  ;;  %v4102_v10 = vand.u32 4294901760, %v3149_v46 }
  0x74   : > { %2637 = vmatmul.mubr.f32.gmra.mxu0 %v3128_v47  ;;  %2799 = vmatprep.subr.mxu1 %v2921_v11  ;;  %v4116_v47 = vand.u32 4294901760, %v3293_v34 }
  0x75   : > { %2639 = vmatprep.mubr.f32.mxu0 %v3140_v2  ;;  %2740 = vmatpush3.msra.mxu0 %v2964_v23  ;;  %v4104_v23 = vand.u32 4294901760, %v3184_v35  ;;  %v4117_v2 = vand.u32 4294901760, %v3300_v45 }
  0x76   : > { %2697 = vmatmul.mubr.f32.gmra.mxu1 %v4100_v9 }
  0x77   : > { %2699 = vmatprep.mubr.f32.mxu1 %v4101_v22  ;;  %2800 = vmatpush3.msra.mxu1 %v2921_v11  ;;  %v4106_v11 = vld [vmem:[#allocation22_spill] sm:$0xff] }
  0x78   : > { %2640 = vmatmul.mubr.f32.gmra.mxu0 %v3149_v46  ;;  %v4108_v63 = vand.u32 4294901760, %v4106_v11  ;;  %v4118_v46 = vand.u32 4294901760, %v3324_v13 }
  0x79   : > { %2642 = vmatprep.mubr.f32.mxu0 %v3163_v28  ;;  %v4119_v28 = vand.u32 4294901760, %v3329_v7 }
  0x7a   : > { %2700 = vmatmul.mubr.f32.gmra.mxu1 %v4102_v10 }
  0x7b   : > { %2702 = vmatprep.mubr.f32.mxu1 %v4103_v54 }
  0x7c   : > { %2643 = vmatmul.mubr.f32.gmra.mxu0 %v3184_v35  ;;  %v4121_v35 = vld [vmem:[#allocation2_spill] sm:$0xff] }
  0x7d   : > { %2645 = vmatprep.mubr.f32.mxu0 %v3198_v39  ;;  %v4123_v39 = vld [vmem:[#allocation4_spill] sm:$0xff] }
  0x7e   : > { %2703 = vmatmul.mubr.f32.gmra.mxu1 %v4104_v23 }
  0x7f   : > { %2705 = vmatprep.mubr.f32.mxu1 %v4105_v59 }
  0x80   : > { %2646 = vmatmul.mubr.f32.gmra.mxu0 %v3213_v55  ;;  %v4114_v55 = vand.u32 4294901760, %v4113_v42 }
  0x81   : > { %2648 = vmatprep.mubr.f32.mxu0 %v4106_v11 }
  0x82   : > { %2706 = vmatmul.mubr.f32.gmra.mxu1 %v4107_v60 }
  0x83   : > { %2708 = vmatprep.mubr.f32.mxu1 %v4108_v63 }
  0x84   : > { %2649 = vmatmul.mubr.f32.gmra.mxu0 %v4109_v8 }
  0x85   : > { %2651 = vmatprep.mubr.f32.mxu0 %v4110_v26 }
  0x86   : > { %2709 = vmatmul.mubr.f32.gmra.mxu1 %v4111_v36 }
  0x87   : > { %2711 = vmatprep.mubr.f32.mxu1 %v4112_v30 }
  0x88   : > { %2652 = vmatmul.mubr.f32.gmra.mxu0 %v4113_v42 }
  0x89   : > { %2654 = vmatprep.mubr.f32.mxu0 %v3266_v51  ;;  %v4126_v51 = vld [vmem:[#allocation7_spill] sm:$0xff] }
  0x8a   : > { %2712 = vmatmul.mubr.f32.gmra.mxu1 %v4114_v55 }
  0x8b   : > { %2714 = vmatprep.mubr.f32.mxu1 %v4115_v48 }
  0x8c   : > { %2655 = vmatmul.mubr.f32.gmra.mxu0 %v3293_v34  ;;  %v4127_v34 = vld [vmem:[#allocation8_spill] sm:$0xff] }
  0x8d   : > { %2657 = vmatprep.mubr.f32.mxu0 %v3300_v45  ;;  %v4120_v45 = vand.u32 4294901760, %v3352_v37 }
  0x8e   : > { %2715 = vmatmul.mubr.f32.gmra.mxu1 %v4116_v47 }
  0x8f   : > { %2717 = vmatprep.mubr.f32.mxu1 %v4117_v2 }
  0x90   : > { %2658 = vmatmul.mubr.f32.gmra.mxu0 %v3324_v13  ;;  %v4128_v13 = vld [vmem:[#allocation9_spill] sm:$0xff] }
  0x91   : > { %2660 = vmatprep.mubr.f32.mxu0 %v3329_v7  ;;  %v4129_v7 = vld [vmem:[#allocation10_spill] sm:$0xff] }
  0x92   : > { %2718 = vmatmul.mubr.f32.gmra.mxu1 %v4118_v46 }
  0x93   : > { %2720 = vmatprep.mubr.f32.mxu1 %v4119_v28 }
  0x94   : > { %2661 = vmatmul.mubr.f32.gmra.mxu0 %v3346_v0  ;;  %v4122_v0 = vld [vmem:[#allocation3_spill] sm:$0xff] }
  0x95   : > { %2663 = vmatprep.mubr.f32.mxu0 %v3352_v37  ;;  %v4131_v37 = vld [vmem:[#allocation12_spill] sm:$0xff] }
  0x96   : > { %2721 = vmatmul.mubr.f32.gmra.mxu1 %v659_v14  ;;  %v4132_v14 = vld [vmem:[#allocation13_spill] sm:$0xff] }
  0x97   : > { %2723 = vmatprep.mubr.f32.mxu1 %v4120_v45 }
  0x98   : > { %2664 = vmatmul.mubr.f32.gmra.mxu0 %v3364_v53  ;;  %v4124_v53 = vld [vmem:[#allocation5_spill] sm:$0xff] }
  0x99   : > { %2666 = vmatprep.mubr.f32.mxu0 %v3373_v31  ;;  %v4133_v31 = vld [vmem:[#allocation14_spill] sm:$0xff] }
  0x9a   : > { %2724 = vmatmul.mubr.f32.gmra.mxu1 %v679_v57  ;;  %v4134_v57 = vld [vmem:[#allocation15_spill] sm:$0xff] }
  0x9b   : > { %2726 = vmatprep.mubr.f32.mxu1 %v689_v61  ;;  %v4125_v61 = vld [vmem:[#allocation6_spill] sm:$0xff] }
  0x9c   : > { %2667 = vmatmul.mubr.f32.gmra.mxu0 %v3382_v41  ;;  %v4130_v41 = vld [vmem:[#allocation11_spill] sm:$0xff] }
  0x9d   : > { %2741 = vmatprep.mubr.f32.mxu0 %v4121_v35 }
  0x9e   : > { %2727 = vmatmul.mubr.f32.gmra.mxu1 %v699_v32  ;;  %v4136_v32 = vld [vmem:[#allocation17_spill] sm:$0xff] }
  0x9f   : > { %2801 = vmatprep.mubr.f32.mxu1 %v4121_v35 }
  0xa0   : > { %2742 = vmatmul.mubr.f32.vlgmr.msra.gmra.mxu0 %v4122_v0 }
  0xa1   : > { %2744 = vmatprep.mubr.f32.mxu0 %v4123_v39 }
  0xa2   : > { %2802 = vmatmul.mubr.f32.vlgmr.msra.gmra.mxu1 %v4122_v0 }
  0xa3   : > { %2804 = vmatprep.mubr.f32.mxu1 %v4123_v39 }
  0xa4   : > { %2745 = vmatmul.mubr.f32.gmra.mxu0 %v4124_v53 }
  0xa5   : > { %2747 = vmatprep.mubr.f32.mxu0 %v4125_v61 }
  0xa6   : > { %2805 = vmatmul.mubr.f32.gmra.mxu1 %v4124_v53 }
  0xa7   : > { %2807 = vmatprep.mubr.f32.mxu1 %v4125_v61 }
  0xa8   : > { %2748 = vmatmul.mubr.f32.gmra.mxu0 %v4126_v51 }
  0xa9   : > { %2750 = vmatprep.mubr.f32.mxu0 %v4127_v34 }
  0xaa   : > { %2808 = vmatmul.mubr.f32.gmra.mxu1 %v4126_v51 }
  0xab   : > { %2810 = vmatprep.mubr.f32.mxu1 %v4127_v34 }
  0xac   : > { %2751 = vmatmul.mubr.f32.gmra.mxu0 %v4128_v13 }
  0xad   : > { %2753 = vmatprep.mubr.f32.mxu0 %v4129_v7 }
  0xae   : > { %2811 = vmatmul.mubr.f32.gmra.mxu1 %v4128_v13 }
  0xaf   : > { %2813 = vmatprep.mubr.f32.mxu1 %v4129_v7 }
  0xb0   : > { %2754 = vmatmul.mubr.f32.gmra.mxu0 %v4130_v41 }
  0xb1   : > { %2756 = vmatprep.mubr.f32.mxu0 %v4131_v37 }
  0xb2   : > { %2814 = vmatmul.mubr.f32.gmra.mxu1 %v4130_v41 }
  0xb3   : > { %2816 = vmatprep.mubr.f32.mxu1 %v4131_v37 }
  0xb4   : > { %2757 = vmatmul.mubr.f32.gmra.mxu0 %v4132_v14 }
  0xb5   : > { %2759 = vmatprep.mubr.f32.mxu0 %v4133_v31 }
  0xb6   : > { %2817 = vmatmul.mubr.f32.gmra.mxu1 %v4132_v14 }
  0xb7   : > { %2819 = vmatprep.mubr.f32.mxu1 %v4133_v31 }
  0xb8   : > { %2760 = vmatmul.mubr.f32.gmra.mxu0 %v4134_v57 }
  0xb9   : > { %2762 = vmatprep.mubr.f32.mxu0 %v4135_v50 }
  0xba   : > { %2820 = vmatmul.mubr.f32.gmra.mxu1 %v4134_v57 }
  0xbb   : > { %2822 = vmatprep.mubr.f32.mxu1 %v4135_v50 }
  0xbc   : > { %2763 = vmatmul.mubr.f32.gmra.mxu0 %v4136_v32 }
  0xbd   : > { %2765 = vmatprep.mubr.f32.mxu0 %v4137_v6 }
  0xbe   : > { %2823 = vmatmul.mubr.f32.gmra.mxu1 %v4136_v32 }
  0xbf   : > { %2825 = vmatprep.mubr.f32.mxu1 %v4137_v6 }
  0xc0   : > { %2766 = vmatmul.mubr.f32.gmra.mxu0 %v4138_v24 }
  0xc1   : > { %2768 = vmatprep.mubr.f32.mxu0 %v4139_v33 }
  0xc2   : > { %2826 = vmatmul.mubr.f32.gmra.mxu1 %v4138_v24 }
  0xc3   : > { %2828 = vmatprep.mubr.f32.mxu1 %v4139_v33 }
  0xc4   : > { %2769 = vmatmul.mubr.f32.gmra.mxu0 %v4140_v38 }
  0xc5   : > { %2771 = vmatprep.mubr.f32.mxu0 %v3226_v15 }
  0xc6   : > { %2829 = vmatmul.mubr.f32.gmra.mxu1 %v4140_v38 }
  0xc7   : > { %2831 = vmatprep.mubr.f32.mxu1 %v3226_v15 }
  0xc8   : > { %2772 = vmatmul.mubr.f32.gmra.mxu0 %v4141_v29 }
  0xc9   : > { %2774 = vmatprep.mubr.f32.mxu0 %v3236_v58 }
  0xca   : > { %2832 = vmatmul.mubr.f32.gmra.mxu1 %v4141_v29 }
  0xcb   : > { %2834 = vmatprep.mubr.f32.mxu1 %v3236_v58 }
  0xcc   : > { %2775 = vmatmul.mubr.f32.gmra.mxu0 %v3268_v56 }
  0xcd   : > { %2777 = vmatprep.mubr.f32.mxu0 %v3276_v43 }
  0xce   : > { %2835 = vmatmul.mubr.f32.gmra.mxu1 %v3268_v56 }
  0xcf   : > { %2837 = vmatprep.mubr.f32.mxu1 %v3276_v43 }
  0xd0   : > { %2778 = vmatmul.mubr.f32.gmra.mxu0 %v3302_v52 }
  0xd1   : > { %2780 = vmatprep.mubr.f32.mxu0 %v3307_v40 }
  0xd2   : > { %2838 = vmatmul.mubr.f32.gmra.mxu1 %v3302_v52 }
  0xd3   : > { %2840 = vmatprep.mubr.f32.mxu1 %v3307_v40  ;;  %v3592_v40 = vld [vmem:[%s3984_s2] ss:$0 sm:$0xff] }
  0xd4   : > { %2781 = vmatmul.mubr.f32.gmra.mxu0 %v3326_v62 }
  0xd5   : > { %2783 = vmatprep.mubr.f32.mxu0 %v3331_v1 }
  0xd6   : > { %2841 = vmatmul.mubr.f32.gmra.mxu1 %v3326_v62 }
  0xd7   : > { %2843 = vmatprep.mubr.f32.mxu1 %v3331_v1 }
  0xd8   : > { %2784 = vmatmul.mubr.f32.gmra.mxu0 %v3348_v16 }
  0xd9   : > { %2786 = vmatprep.mubr.f32.mxu0 %v3354_v44 }
  0xda   : > { %2844 = vmatmul.mubr.f32.gmra.mxu1 %v3348_v16 }
  0xdb   : > { %2846 = vmatprep.mubr.f32.mxu1 %v3354_v44 }
  0xdc   : > { %2787 = vmatmul.mubr.f32.gmra.mxu0 %v3366_v17 }
  0xde   : > { %2847 = vmatmul.mubr.f32.gmra.mxu1 %v3366_v17 }
  0xe0   : > { %v2503_v62 = vpop.f32.mrf.mxu0 }
  0xe1   : > { %v404_v52 = vadd.f32 %v2503_v62, %v3592_v40 }
  0xe2   : > { %v393_v43 = vpop.f32.mrf.mxu0  ;;  %v2563_v15 = vpop.f32.mrf.mxu1 }
  0xe3   : > { %v394_v58 = vadd.f32 %v3592_v40, %v393_v43  ;;  %v3596_v1 = vadd.f32 %v2563_v15, %v404_v52 }
  0xe4   : > { %v2506_v56 = vpop.f32.mrf.mxu0  ;;  %v804_v44 = vpop.f32.mrf.mxu1 }
  0xe5   : > { %v424_v16 = vadd.f32 %v2506_v56, %v3592_v40  ;;  %v3599_v25 = vadd.f32 %v804_v44, %v394_v58 }
  0xe6   : > { %v413_v17 = vpop.f32.mrf.mxu0  ;;  %v2566_v12 = vpop.f32.mrf.mxu1 }
  0xe7   : > { %v414_v27 = vadd.f32 %v3592_v40, %v413_v17  ;;  %v3602_v18 = vadd.f32 %v2566_v12, %v424_v16 }
  0xe8   : > { %v2509_v49 = vpop.f32.mrf.mxu0  ;;  %v816_v3 = vpop.f32.mrf.mxu1 }
  0xe9   : > { %v444_v19 = vadd.f32 %v2509_v49, %v3592_v40  ;;  %v3605_v4 = vadd.f32 %v816_v3, %v414_v27 }
  0xea   : > { %v433_v20 = vpop.f32.mrf.mxu0  ;;  %v2569_v5 = vpop.f32.mrf.mxu1 }
  0xeb   : > { %v434_v21 = vadd.f32 %v3592_v40, %v433_v20  ;;  %v3608_v9 = vadd.f32 %v2569_v5, %v444_v19 }
  0xec   : > { %v2512_v22 = vpop.f32.mrf.mxu0  ;;  %v828_v10 = vpop.f32.mrf.mxu1 }
  0xed   : > { %v464_v54 = vadd.f32 %v2512_v22, %v3592_v40  ;;  %v3611_v23 = vadd.f32 %v828_v10, %v434_v21 }
  0xee   : > { %v453_v59 = vpop.f32.mrf.mxu0  ;;  %v2572_v11 = vpop.f32.mrf.mxu1 }
  0xef   : > { %v454_v60 = vadd.f32 %v3592_v40, %v453_v59  ;;  %v3614_v63 = vadd.f32 %v2572_v11, %v464_v54 }
  0xf0   : > { %v2515_v8 = vpop.f32.mrf.mxu0  ;;  %v840_v26 = vpop.f32.mrf.mxu1 }
  0xf1   : > { %v484_v36 = vadd.f32 %v2515_v8, %v3592_v40  ;;  %v3617_v30 = vadd.f32 %v840_v26, %v454_v60 }
  0xf2   : > { %v473_v42 = vpop.f32.mrf.mxu0  ;;  %v2575_v55 = vpop.f32.mrf.mxu1 }
  0xf3   : > { %v474_v48 = vadd.f32 %v3592_v40, %v473_v42  ;;  %v3620_v47 = vadd.f32 %v2575_v55, %v484_v36 }
  0xf4   : > { %v2518_v2 = vpop.f32.mrf.mxu0  ;;  %v852_v46 = vpop.f32.mrf.mxu1 }
  0xf5   : > { %v504_v28 = vadd.f32 %v2518_v2, %v3592_v40  ;;  %v3623_v45 = vadd.f32 %v852_v46, %v474_v48 }
  0xf6   : > { %v493_v35 = vpop.f32.mrf.mxu0  ;;  %v2578_v0 = vpop.f32.mrf.mxu1 }
  0xf7   : > { %v494_v39 = vadd.f32 %v3592_v40, %v493_v35  ;;  %v3626_v53 = vadd.f32 %v2578_v0, %v504_v28 }
  0xf8   : > { %v2521_v61 = vpop.f32.mrf.mxu0  ;;  %v864_v51 = vpop.f32.mrf.mxu1 }
  0xf9   : > { %v524_v34 = vadd.f32 %v2521_v61, %v3592_v40  ;;  %v3629_v13 = vadd.f32 %v864_v51, %v494_v39 }
  0xfa   : > { %v513_v7 = vpop.f32.mrf.mxu0  ;;  %v2581_v41 = vpop.f32.mrf.mxu1 }
  0xfb   : > { %v514_v37 = vadd.f32 %v3592_v40, %v513_v7  ;;  %v3632_v14 = vadd.f32 %v2581_v41, %v524_v34 }
  0xfc   : > { %v2524_v31 = vpop.f32.mrf.mxu0  ;;  %v876_v57 = vpop.f32.mrf.mxu1 }
  0xfd   : > { %v544_v50 = vadd.f32 %v2524_v31, %v3592_v40  ;;  %v3635_v32 = vadd.f32 %v876_v57, %v514_v37 }
  0xfe   : > { %v533_v6 = vpop.f32.mrf.mxu0  ;;  %v2584_v24 = vpop.f32.mrf.mxu1 }
  0xff   : > { %v534_v33 = vadd.f32 %v3592_v40, %v533_v6  ;;  %v3638_v38 = vadd.f32 %v2584_v24, %v544_v50 }
 0x100   : > { %v2527_v29 = vpop.f32.mrf.mxu0  ;;  %v888_v62 = vpop.f32.mrf.mxu1 }
 0x101   : > { %v564_v52 = vadd.f32 %v2527_v29, %v3592_v40  ;;  %v3641_v43 = vadd.f32 %v888_v62, %v534_v33 }
 0x102   : > { %v553_v15 = vpop.f32.mrf.mxu0  ;;  %v2587_v58 = vpop.f32.mrf.mxu1 }
 0x103   : > { %v554_v56 = vadd.f32 %v3592_v40, %v553_v15  ;;  %v3644_v44 = vadd.f32 %v2587_v58, %v564_v52 }
 0x104   : > { %v2530_v16 = vpop.f32.mrf.mxu0  ;;  %v900_v17 = vpop.f32.mrf.mxu1 }
 0x105   : > { %v584_v12 = vadd.f32 %v2530_v16, %v3592_v40  ;;  %v3647_v27 = vadd.f32 %v900_v17, %v554_v56 }
 0x106   : > { %v573_v49 = vpop.f32.mrf.mxu0  ;;  %v2590_v3 = vpop.f32.mrf.mxu1 }
 0x107   : > { %v574_v19 = vadd.f32 %v3592_v40, %v573_v49  ;;  %v3650_v20 = vadd.f32 %v2590_v3, %v584_v12 }
 0x108   : > { %v2533_v5 = vpop.f32.mrf.mxu0  ;;  %v912_v21 = vpop.f32.mrf.mxu1 }
 0x109   : > { %4142 = vst [vmem:[#allocation22_spill] sm:$0xff] %v3650_v20  ;;  %v604_v22 = vadd.f32 %v2533_v5, %v3592_v40  ;;  %v3653_v10 = vadd.f32 %v912_v21, %v574_v19 }
 0x10a   : > { %v593_v54 = vpop.f32.mrf.mxu0  ;;  %v2593_v59 = vpop.f32.mrf.mxu1 }
 0x10b   : > { %4143 = vst [vmem:[#allocation24_spill] sm:$0xff] %v3653_v10  ;;  %v594_v11 = vadd.f32 %v3592_v40, %v593_v54  ;;  %v3656_v60 = vadd.f32 %v2593_v59, %v604_v22 }
 0x10c   : > { %v2536_v8 = vpop.f32.mrf.mxu0  ;;  %v924_v26 = vpop.f32.mrf.mxu1 }
 0x10d   : > { %4144 = vst [vmem:[#allocation25_spill] sm:$0xff] %v3656_v60  ;;  %v624_v36 = vadd.f32 %v2536_v8, %v3592_v40  ;;  %v3659_v42 = vadd.f32 %v924_v26, %v594_v11 }
 0x10e   : > { %v613_v55 = vpop.f32.mrf.mxu0  ;;  %v2596_v48 = vpop.f32.mrf.mxu1 }
 0x10f   : > { %4145 = vst [vmem:[#allocation26_spill] sm:$0xff] %v3659_v42  ;;  %v614_v2 = vadd.f32 %v3592_v40, %v613_v55  ;;  %v3662_v46 = vadd.f32 %v2596_v48, %v624_v36 }
 0x110   : > { %v2539_v28 = vpop.f32.mrf.mxu0  ;;  %v936_v35 = vpop.f32.mrf.mxu1 }
 0x111   : > { %4146 = vst [vmem:[#allocation2_spill] sm:$0xff] %v3662_v46  ;;  %v644_v0 = vadd.f32 %v2539_v28, %v3592_v40  ;;  %v3665_v39 = vadd.f32 %v936_v35, %v614_v2 }
 0x112   : > { %v633_v61 = vpop.f32.mrf.mxu0  ;;  %v2599_v51 = vpop.f32.mrf.mxu1 }
 0x113   : > { %4147 = vst [vmem:[#allocation3_spill] sm:$0xff] %v3665_v39  ;;  %v634_v34 = vadd.f32 %v3592_v40, %v633_v61  ;;  %v3668_v7 = vadd.f32 %v2599_v51, %v644_v0 }
 0x114   : > { %v2542_v41 = vpop.f32.mrf.mxu0  ;;  %v948_v37 = vpop.f32.mrf.mxu1 }
 0x115   : > { %4148 = vst [vmem:[#allocation4_spill] sm:$0xff] %v3668_v7  ;;  %v664_v31 = vadd.f32 %v2542_v41, %v3592_v40  ;;  %v3671_v57 = vadd.f32 %v948_v37, %v634_v34 }
 0x116   : > { %v653_v50 = vpop.f32.mrf.mxu0  ;;  %v2602_v6 = vpop.f32.mrf.mxu1 }
 0x117   : > { %4149 = vst [vmem:[#allocation5_spill] sm:$0xff] %v3671_v57  ;;  %v654_v24 = vadd.f32 %v3592_v40, %v653_v50  ;;  %v3674_v33 = vadd.f32 %v2602_v6, %v664_v31 }
 0x118   : > { %v2545_v29 = vpop.f32.mrf.mxu0  ;;  %v960_v62 = vpop.f32.mrf.mxu1 }
 0x119   : > { %4150 = vst [vmem:[#allocation6_spill] sm:$0xff] %v3674_v33  ;;  %v684_v52 = vadd.f32 %v2545_v29, %v3592_v40  ;;  %v3677_v15 = vadd.f32 %v960_v62, %v654_v24 }
 0x11a   : > { %v673_v58 = vpop.f32.mrf.mxu0  ;;  %v2605_v56 = vpop.f32.mrf.mxu1 }
 0x11b   : > { %4151 = vst [vmem:[#allocation7_spill] sm:$0xff] %v3677_v15  ;;  %v674_v16 = vadd.f32 %v3592_v40, %v673_v58  ;;  %v3680_v17 = vadd.f32 %v2605_v56, %v684_v52 }
 0x11c   : > { %v2548_v12 = vpop.f32.mrf.mxu0  ;;  %v972_v49 = vpop.f32.mrf.mxu1 }
 0x11d   : > { %4152 = vst [vmem:[#allocation8_spill] sm:$0xff] %v3680_v17  ;;  %v704_v3 = vadd.f32 %v2548_v12, %v3592_v40  ;;  %v3683_v19 = vadd.f32 %v972_v49, %v674_v16 }
 0x11e   : > { %v693_v5 = vpop.f32.mrf.mxu0  ;;  %v2608_v21 = vpop.f32.mrf.mxu1 }
 0x11f   : > { %4153 = vst [vmem:[#allocation9_spill] sm:$0xff] %v3683_v19  ;;  %v694_v22 = vadd.f32 %v3592_v40, %v693_v5  ;;  %v3686_v54 = vadd.f32 %v2608_v21, %v704_v3 }
 0x120   : > { %v2623_v59 = vpop.f32.mrf.mxu0  ;;  %v984_v11 = vpop.f32.mrf.mxu1 }
 0x121   : > { %4154 = vst [vmem:[#allocation10_spill] sm:$0xff] %v3686_v54  ;;  %v3688_v8 = vadd.f32 %v984_v11, %v694_v22 }
 0x122   : > { %v1074_v26 = vpop.f32.mrf.mxu0  ;;  %v3690_v36 = vpop.f32.mrf.mxu1 }
 0x123   : > { %4155 = vst [vmem:[#allocation11_spill] sm:$0xff] %v3688_v8 }
 0x124   : > { %v3692_v55 = vpop.f32.mrf.mxu0  ;;  %v3694_v48 = vpop.f32.mrf.mxu1 }
 0x126   : > { %v3696_v2 = vpop.f32.mrf.mxu0  ;;  %v3698_v28 = vpop.f32.mrf.mxu1 }
 0x128   : > { %v3700_v35 = vpop.f32.mrf.mxu0  ;;  %v3702_v40 = vpop.f32.mrf.mxu1 }
 0x12a   : > { %v3704_v0 = vpop.f32.mrf.mxu0  ;;  %v3706_v61 = vpop.f32.mrf.mxu1 }
 0x12c   : > { %v3708_v51 = vpop.f32.mrf.mxu0  ;;  %v3710_v34 = vpop.f32.mrf.mxu1 }
 0x12e   : > { %v3712_v41 = vpop.f32.mrf.mxu0  ;;  %v3714_v37 = vpop.f32.mrf.mxu1 }
 0x130   : > { %v3716_v31 = vpop.f32.mrf.mxu0  ;;  %v3718_v50 = vpop.f32.mrf.mxu1 }
 0x132   : > { %v3720_v6 = vpop.f32.mrf.mxu0  ;;  %v3722_v24 = vpop.f32.mrf.mxu1 }
 0x134   : > { %v3724_v29 = vpop.f32.mrf.mxu0  ;;  %v3726_v62 = vpop.f32.mrf.mxu1 }
 0x136   : > { %v3728_v52 = vpop.f32.mrf.mxu0  ;;  %v3730_v58 = vpop.f32.mrf.mxu1 }
 0x138   : > { %v3732_v56 = vpop.f32.mrf.mxu0  ;;  %v3734_v16 = vpop.f32.mrf.mxu1 }
 0x13a   : > { %v3736_v12 = vpop.f32.mrf.mxu0  ;;  %v3738_v49 = vpop.f32.mrf.mxu1 }
 0x13c   : > { %v3740_v3 = vpop.f32.mrf.mxu0  ;;  %v3742_v5 = vpop.f32.mrf.mxu1 }
 0x13e   : > { %v3744_v21 = vpop.f32.mrf.mxu0  ;;  %v3746_v22 = vpop.f32.mrf.mxu1 }
 0x140   : > { %v3748_v11 = vpop.f32.mrf.mxu0  ;;  %v3750_v8 = vpop.f32.mrf.mxu1 }
 0x142   : > { %v3752_v54 = vpop.f32.mrf.mxu0  ;;  %v3754_v19 = vpop.f32.mrf.mxu1 }
 0x144   : > { %v3756_v17 = vpop.f32.mrf.mxu0  ;;  %v3758_v15 = vpop.f32.mrf.mxu1 }
 0x145   : > { %4156 = vst [vmem:[#allocation12_spill] sm:$0xff] %v3756_v17  ;;  %4157 = vst [vmem:[#allocation13_spill] sm:$0xff] %v3758_v15 }
 0x146   : > { %v3760_v33 = vpop.f32.mrf.mxu0  ;;  %v3762_v57 = vpop.f32.mrf.mxu1 }
 0x147   : > { %4158 = vst [vmem:[#allocation14_spill] sm:$0xff] %v3760_v33  ;;  %4159 = vst [vmem:[#allocation15_spill] sm:$0xff] %v3762_v57 }
 0x148   : > { %v3764_v7 = vpop.f32.mrf.mxu0  ;;  %v3766_v39 = vpop.f32.mrf.mxu1 }
 0x149   : > { %4160 = vst [vmem:[#allocation16_spill] sm:$0xff] %v3764_v7  ;;  %4161 = vst [vmem:[#allocation17_spill] sm:$0xff] %v3766_v39 }
 0x14a   : > { %v3768_v46 = vpop.f32.mrf.mxu0  ;;  %v3770_v42 = vpop.f32.mrf.mxu1 }
 0x14b   : > { %4162 = vst [vmem:[#allocation18_spill] sm:$0xff] %v3768_v46  ;;  %4163 = vst [vmem:[#allocation19_spill] sm:$0xff] %v3770_v42 }
 0x14c   : > { %v3772_v60 = vpop.f32.mrf.mxu0  ;;  %v3774_v10 = vpop.f32.mrf.mxu1 }
 0x14d   : > { %4164 = vst [vmem:[#allocation20_spill] sm:$0xff] %v3772_v60  ;;  %4165 = vst [vmem:[#allocation21_spill] sm:$0xff] %v3774_v10 }
 0x14e   : > { %v3776_v20 = vpop.f32.mrf.mxu0  ;;  %v3778_v17 = vpop.f32.mrf.mxu1 }
 0x14f   : > { %4166 = vst [vmem:[#allocation23_spill] sm:$0xff] %v3776_v20  ;;  %4167 = vst [vmem:[#allocation27_spill] sm:$0xff] %v3778_v17 }
 0x150   : > { %v3780_v15 = vpop.f32.mrf.mxu0  ;;  %v3782_v33 = vpop.f32.mrf.mxu1 }
 0x151   : > { %4168 = vst [vmem:[#allocation28_spill] sm:$0xff] %v3780_v15  ;;  %4169 = vst [vmem:[#allocation29_spill] sm:$0xff] %v3782_v33 }
 0x152   : > { %v3784_v57 = vpop.f32.mrf.mxu0  ;;  %v3786_v7 = vpop.f32.mrf.mxu1 }
 0x153   : > { %4170 = vst [vmem:[#allocation30_spill] sm:$0xff] %v3784_v57  ;;  %4171 = vst [vmem:[#allocation31_spill] sm:$0xff] %v3786_v7  ;;  %v1082_v57 = vadd.f32 %v2623_v59, %v3596_v1  ;;  %v1089_v59 = vadd.f32 %v3696_v2, %v3605_v4 }
 0x154   : > { %v3788_v39 = vpop.f32.mrf.mxu0  ;;  %v3790_v46 = vpop.f32.mrf.mxu1 }
 0x155   : > { %4172 = vst [vmem:[#allocation32_spill] sm:$0xff] %v3788_v39  ;;  %4173 = vst [vmem:[#allocation33_spill] sm:$0xff] %v3790_v46  ;;  %v1075_v46 = vadd.f32 %v1074_v26, %v3599_v25 }
 0x156   : > { %v3792_v42 = vpop.f32.mrf.mxu0  ;;  %v3794_v60 = vpop.f32.mrf.mxu1 }
 0x157   : > { %4174 = vst [vmem:[#allocation34_spill] sm:$0xff] %v3792_v42  ;;  %4175 = vst [vmem:[#allocation35_spill] sm:$0xff] %v3794_v60  ;;  %v1371_v1 = vadd.f32 %v3694_v48, %v1075_v46  ;;  %v1110_v46 = vadd.f32 %v3700_v35, %v3608_v9  ;;  %v1124_v9 = vadd.f32 %v3708_v51, %v3614_v63 }
 0x158   : > { %v3796_v10 = vpop.f32.mrf.mxu0  ;;  %v3798_v20 = vpop.f32.mrf.mxu1 }
 0x159   : > { %4176 = vst [vmem:[#allocation36_spill] sm:$0xff] %v3796_v10  ;;  %4177 = vst [vmem:[#allocation37_spill] sm:$0xff] %v3798_v20  ;;  %v1379_v10 = vadd.f32 %v3690_v36, %v1082_v57  ;;  %v1103_v36 = vadd.f32 %v3704_v0, %v3611_v23  ;;  %v1427_v63 = vadd.f32 %v3714_v37, %v1124_v9 }
 0x15a   : > { %v3800_v17 = vpop.f32.mrf.mxu0  ;;  %v3802_v33 = vpop.f32.mrf.mxu1 }
 0x15b   : > { %4178 = vst [vmem:[#allocation38_spill] sm:$0xff] %v3800_v17  ;;  %v1096_v17 = vadd.f32 %v3692_v55, %v3602_v18  ;;  %v1403_v23 = vadd.f32 %v3710_v34, %v1103_v36 }
 0x15c   : > { %v3805_v7 = vpop.f32.mrf.mxu0  ;;  %v3807_v39 = vpop.f32.mrf.mxu1 }
 0x15d   : > { %4179 = vst [vmem:[#allocation39_spill] sm:$0xff] %v3805_v7  ;;  %4180 = vst [vmem:[#allocation40_spill] sm:$0xff] %v3807_v39  ;;  %v1395_v18 = vadd.f32 %v3698_v28, %v1096_v17  ;;  %v1411_v17 = vadd.f32 %v3706_v61, %v1110_v46 }
 0x15e   : > { %v3810_v42 = vpop.f32.mrf.mxu0  ;;  %v3812_v60 = vpop.f32.mrf.mxu1 }
 0x160   : > { %v2743_v20 = vpop.f32.mrf.mxu0  ;;  %v3817_v15 = vpop.f32.mrf.mxu1 }
 0x161   : > { %4181 = vst [vmem:[#allocation41_spill] sm:$0xff] %v3817_v15  ;;  %v1714_v39 = vadd.f32 %v2743_v20, %v1379_v10  ;;  %v1387_v10 = vadd.f32 %v3702_v40, %v1089_v59  ;;  %v1117_v40 = vadd.f32 %v3712_v41, %v3617_v30  ;;  %v1131_v41 = vadd.f32 %v3720_v6, %v3623_v45 }
 0x162   : > { %v1707_v7 = vpop.f32.mrf.mxu0  ;;  %v2803_v25 = vpop.f32.mrf.mxu1  ;;  %v1145_v6 = vadd.f32 %v3728_v52, %v3629_v13  ;;  %v1159_v52 = vadd.f32 %v3736_v12, %v3635_v32  ;;  %v1173_v12 = vadd.f32 %v3744_v21, %v3641_v43  ;;  %v1187_v21 = vadd.f32 %v3752_v54, %v3647_v27  ;;  %v4185_v54 = vld [vmem:[#allocation24_spill] sm:$0xff] }
 0x163   : > { %v1708_v57 = vadd.f32 %v1707_v7, %v1371_v1  ;;  %v1977_v26 = vadd.f32 %v2803_v25, %v1714_v39  ;;  %v1419_v30 = vadd.f32 %v3718_v50, %v1117_v40  ;;  %v1435_v45 = vadd.f32 %v3726_v62, %v1131_v41 }
 0x164   : > { %v2746_v4 = vpop.f32.mrf.mxu0  ;;  %v1970_v20 = vpop.f32.mrf.mxu1  ;;  %v1451_v13 = vadd.f32 %v3734_v16, %v1145_v6  ;;  %v1467_v32 = vadd.f32 %v3742_v5, %v1159_v52  ;;  %v1483_v43 = vadd.f32 %v3750_v8, %v1173_v12  ;;  %v4189_v6 = vld [vmem:[#allocation16_spill] sm:$0xff]  ;;  %v4196_v12 = vld [vmem:[#allocation21_spill] sm:$0xff] }
 0x165   : > { %2162 = vst.msk [vmem:[%s3827_s8 + $0x8] sm:$0xff] %vm2160_vm1, %v1977_v26  ;;  %v1726_v55 = vadd.f32 %v2746_v4, %v1395_v18  ;;  %v1971_v48 = vadd.f32 %v1970_v20, %v1708_v57 }
 0x166   : > { %v1719_v2 = vpop.f32.mrf.mxu0  ;;  %v2806_v15 = vpop.f32.mrf.mxu1 }
 0x167   : > { %2161 = vst.msk [vmem:[%s3827_s8] sm:$0xff] %vm2160_vm1, %v1971_v48  ;;  %v1720_v39 = vadd.f32 %v1719_v2, %v1387_v10  ;;  %v1989_v7 = vadd.f32 %v2806_v15, %v1726_v55  ;;  %v1138_v15 = vadd.f32 %v3716_v31, %v3620_v47  ;;  %v1152_v31 = vadd.f32 %v3724_v29, %v3626_v53 }
 0x168   : > { %v2749_v28 = vpop.f32.mrf.mxu0  ;;  %v1982_v35 = vpop.f32.mrf.mxu1  ;;  %v1166_v29 = vadd.f32 %v3732_v56, %v3632_v14  ;;  %v1180_v56 = vadd.f32 %v3740_v3, %v3638_v38  ;;  %v1194_v3 = vadd.f32 %v3748_v11, %v3644_v44  ;;  %v4182_v11 = vld [vmem:[#allocation22_spill] sm:$0xff] }
 0x169   : > { %2164 = vst.msk [vmem:[%s3827_s8 + $0x18] sm:$0xff] %vm2160_vm1, %v1989_v7  ;;  %v1738_v0 = vadd.f32 %v2749_v28, %v1411_v17  ;;  %v1983_v61 = vadd.f32 %v1982_v35, %v1720_v39  ;;  %v1443_v47 = vadd.f32 %v3722_v24, %v1138_v15  ;;  %v1459_v53 = vadd.f32 %v3730_v58, %v1152_v31 }
 0x16a   : > { %v1731_v1 = vpop.f32.mrf.mxu0  ;;  %v2809_v59 = vpop.f32.mrf.mxu1  ;;  %v1475_v14 = vadd.f32 %v3738_v49, %v1166_v29  ;;  %v1491_v38 = vadd.f32 %v3746_v22, %v1180_v56  ;;  %v1507_v44 = vadd.f32 %v3754_v19, %v1194_v3  ;;  %v4190_v29 = vld [vmem:[#allocation17_spill] sm:$0xff]  ;;  %v4195_v56 = vld [vmem:[#allocation20_spill] sm:$0xff] }
 0x16b   : > { %2163 = vst.msk [vmem:[%s3827_s8 + $0x10] sm:$0xff] %vm2160_vm1, %v1983_v61  ;;  %v1732_v51 = vadd.f32 %v1731_v1, %v1403_v23  ;;  %v2001_v34 = vadd.f32 %v2809_v59, %v1738_v0 }
 0x16c   : > { %v2752_v25 = vpop.f32.mrf.mxu0  ;;  %v1994_v18 = vpop.f32.mrf.mxu1 }
 0x16d   : > { %2166 = vst.msk [vmem:[%s3827_s8 + $0x28] sm:$0xff] %vm2160_vm1, %v2001_v34  ;;  %v1750_v46 = vadd.f32 %v2752_v25, %v1427_v63  ;;  %v1995_v37 = vadd.f32 %v1994_v18, %v1732_v51  ;;  %v4183_v18 = vld [vmem:[#allocation12_spill] sm:$0xff] }
 0x16e   : > { %v1743_v57 = vpop.f32.mrf.mxu0  ;;  %v2812_v26 = vpop.f32.mrf.mxu1 }
 0x16f   : > { %2165 = vst.msk [vmem:[%s3827_s8 + $0x20] sm:$0xff] %vm2160_vm1, %v1995_v37  ;;  %v1744_v4 = vadd.f32 %v1743_v57, %v1419_v30  ;;  %v2013_v50 = vadd.f32 %v2812_v26, %v1750_v46  ;;  %v1208_v30 = vadd.f32 %v4183_v18, %v4182_v11  ;;  %v4184_v57 = vld [vmem:[#allocation13_spill] sm:$0xff]  ;;  %v4186_v26 = vld [vmem:[#allocation14_spill] sm:$0xff] }
 0x170   : > { %v2755_v20 = vpop.f32.mrf.mxu0  ;;  %v2006_v10 = vpop.f32.mrf.mxu1  ;;  %v1499_v27 = vadd.f32 %v4184_v57, %v1187_v21  ;;  %v4201_v21 = vld [vmem:[#allocation28_spill] sm:$0xff]  ;;  %v4202_v11 = vld [vmem:[#allocation29_spill] sm:$0xff] }
 0x171   : > { %2168 = vst.msk [vmem:[%s3827_s8 + $0x38] sm:$0xff] %vm2160_vm1, %v2013_v50  ;;  %v1762_v36 = vadd.f32 %v2755_v20, %v1443_v47  ;;  %v2007_v24 = vadd.f32 %v2006_v10, %v1744_v4  ;;  %v1201_v47 = vadd.f32 %v4186_v26, %v4185_v54  ;;  %v4187_v20 = vld [vmem:[#allocation15_spill] sm:$0xff] }
 0x172   : > { %v1755_v55 = vpop.f32.mrf.mxu0  ;;  %v2815_v48 = vpop.f32.mrf.mxu1  ;;  %v1523_v10 = vadd.f32 %v4187_v20, %v1208_v30  ;;  %v4203_v30 = vld [vmem:[#allocation5_spill] sm:$0xff]  ;;  %v4205_v54 = vld [vmem:[#allocation31_spill] sm:$0xff] }
 0x173   : > { %2167 = vst.msk [vmem:[%s3827_s8 + $0x30] sm:$0xff] %vm2160_vm1, %v2007_v24  ;;  %v1756_v2 = vadd.f32 %v1755_v55, %v1435_v45  ;;  %v2025_v62 = vadd.f32 %v2815_v48, %v1762_v36  ;;  %v4188_v45 = vld [vmem:[#allocation25_spill] sm:$0xff] }
 0x174   : > { %v2758_v17 = vpop.f32.mrf.mxu0  ;;  %v2018_v9 = vpop.f32.mrf.mxu1  ;;  %v1222_v36 = vadd.f32 %v4189_v6, %v4188_v45  ;;  %v4208_v45 = vld [vmem:[#allocation33_spill] sm:$0xff] }
 0x175   : > { %2170 = vst.msk [vmem:[%s3827_s8 + $0x48] sm:$0xff] %vm2160_vm1, %v2025_v62  ;;  %v1774_v39 = vadd.f32 %v2758_v17, %v1459_v53  ;;  %v2019_v58 = vadd.f32 %v2018_v9, %v1756_v2  ;;  %v1515_v2 = vadd.f32 %v4190_v29, %v1201_v47  ;;  %v4191_v62 = vld [vmem:[#allocation26_spill] sm:$0xff] }
 0x176   : > { %v1767_v7 = vpop.f32.mrf.mxu0  ;;  %v2818_v28 = vpop.f32.mrf.mxu1  ;;  %v4192_v17 = vld [vmem:[#allocation18_spill] sm:$0xff] }
 0x177   : > { %2169 = vst.msk [vmem:[%s3827_s8 + $0x40] sm:$0xff] %vm2160_vm1, %v2019_v58  ;;  %v1768_v35 = vadd.f32 %v1767_v7, %v1451_v13  ;;  %v2037_v16 = vadd.f32 %v2818_v28, %v1774_v39  ;;  %v1215_v9 = vadd.f32 %v4192_v17, %v4191_v62  ;;  %v4193_v7 = vld [vmem:[#allocation19_spill] sm:$0xff]  ;;  %v4206_v47 = vld [vmem:[#allocation6_spill] sm:$0xff] }
 0x178   : > { %v2761_v23 = vpop.f32.mrf.mxu0  ;;  %v2030_v40 = vpop.f32.mrf.mxu1  ;;  %v1539_v28 = vadd.f32 %v4193_v7, %v1222_v36  ;;  %v4209_v36 = vld [vmem:[#allocation7_spill] sm:$0xff] }
 0x179   : > { %2172 = vst.msk [vmem:[%s3827_s8 + $0x58] sm:$0xff] %vm2160_vm1, %v2037_v16  ;;  %v1786_v0 = vadd.f32 %v2761_v23, %v1475_v14  ;;  %v2031_v49 = vadd.f32 %v2030_v40, %v1768_v35  ;;  %v4194_v14 = vld [vmem:[#allocation2_spill] sm:$0xff]  ;;  %v4211_v62 = vld [vmem:[#allocation35_spill] sm:$0xff] }
 0x17a   : > { %v1779_v61 = vpop.f32.mrf.mxu0  ;;  %v2821_v1 = vpop.f32.mrf.mxu1  ;;  %v1236_v35 = vadd.f32 %v4195_v56, %v4194_v14  ;;  %v4214_v14 = vld [vmem:[#allocation37_spill] sm:$0xff] }
 0x17b   : > { %2171 = vst.msk [vmem:[%s3827_s8 + $0x50] sm:$0xff] %vm2160_vm1, %v2031_v49  ;;  %v1780_v59 = vadd.f32 %v1779_v61, %v1467_v32  ;;  %v2049_v5 = vadd.f32 %v2821_v1, %v1786_v0  ;;  %v1531_v0 = vadd.f32 %v4196_v12, %v1215_v9  ;;  %v4197_v49 = vld [vmem:[#allocation3_spill] sm:$0xff]  ;;  %v4212_v9 = vld [vmem:[#allocation8_spill] sm:$0xff] }
 0x17c   : > { %v2764_v63 = vpop.f32.mrf.mxu0  ;;  %v2042_v15 = vpop.f32.mrf.mxu1  ;;  %v4198_v61 = vld [vmem:[#allocation23_spill] sm:$0xff] }
 0x17d   : > { %2174 = vst.msk [vmem:[%s3827_s8 + $0x68] sm:$0xff] %vm2160_vm1, %v2049_v5  ;;  %v1798_v51 = vadd.f32 %v2764_v63, %v1491_v38  ;;  %v2043_v22 = vadd.f32 %v2042_v15, %v1780_v59  ;;  %v1229_v1 = vadd.f32 %v4198_v61, %v4197_v49  ;;  %v4199_v63 = vld [vmem:[#allocation27_spill] sm:$0xff]  ;;  %v4217_v61 = vld [vmem:[#allocation10_spill] sm:$0xff] }
 0x17e   : > { %v1791_v34 = vpop.f32.mrf.mxu0  ;;  %v2824_v25 = vpop.f32.mrf.mxu1  ;;  %v1555_v15 = vadd.f32 %v4199_v63, %v1236_v35  ;;  %v4215_v35 = vld [vmem:[#allocation9_spill] sm:$0xff] }
 0x17f   : > { %2173 = vst.msk [vmem:[%s3827_s8 + $0x60] sm:$0xff] %vm2160_vm1, %v2043_v22  ;;  %v1792_v41 = vadd.f32 %v1791_v34, %v1483_v43  ;;  %v2061_v8 = vadd.f32 %v2824_v25, %v1798_v51  ;;  %v4200_v43 = vld [vmem:[#allocation4_spill] sm:$0xff]  ;;  %v1547_v18 = vadd.f32 %v4202_v11, %v1229_v1  ;;  %v4218_v1 = vld [vmem:[#allocation39_spill] sm:$0xff] }
 0x180   : > { %v2767_v46 = vpop.f32.mrf.mxu0  ;;  %v2054_v37 = vpop.f32.mrf.mxu1  ;;  %v1250_v51 = vadd.f32 %v4201_v21, %v4200_v43  ;;  %v4220_v21 = vld [vmem:[#allocation11_spill] sm:$0xff] }
 0x181   : > { %2176 = vst.msk [vmem:[%s3827_s8 + $0x78] sm:$0xff] %vm2160_vm1, %v2061_v8  ;;  %v1810_v31 = vadd.f32 %v2767_v46, %v1507_v44  ;;  %v2055_v19 = vadd.f32 %v2054_v37, %v1792_v41  ;;  %v4204_v41 = vld [vmem:[#allocation30_spill] sm:$0xff] }
 0x182   : > { %v1803_v4 = vpop.f32.mrf.mxu0  ;;  %v2827_v50 = vpop.f32.mrf.mxu1  ;;  %v1243_v8 = vadd.f32 %v4204_v41, %v4203_v30  ;;  %v1571_v26 = vadd.f32 %v4205_v54, %v1250_v51  ;;  %v1285_v51 = vadd.f32 %v3810_v42, %v4220_v21 }
 0x183   : > { %2175 = vst.msk [vmem:[%s3827_s8 + $0x70] sm:$0xff] %vm2160_vm1, %v2055_v19  ;;  %v1804_v24 = vadd.f32 %v1803_v4, %v1499_v27  ;;  %v2073_v55 = vadd.f32 %v2827_v50, %v1810_v31  ;;  %v4207_v31 = vld [vmem:[#allocation32_spill] sm:$0xff] }
 0x184   : > { %v2770_v48 = vpop.f32.mrf.mxu0  ;;  %v2066_v53 = vpop.f32.mrf.mxu1  ;;  %v1264_v19 = vadd.f32 %v4207_v31, %v4206_v47  ;;  %v1563_v6 = vadd.f32 %v4208_v45, %v1243_v8  ;;  %v4221_v8 = vld [vmem:[#allocation41_spill] sm:$0xff] }
 0x185   : > { %2178 = vst.msk [vmem:[%s3827_s8 + $0x88] sm:$0xff] %vm2160_vm1, %v2073_v55  ;;  %v1822_v13 = vadd.f32 %v2770_v48, %v1523_v10  ;;  %v2067_v52 = vadd.f32 %v2066_v53, %v1804_v24  ;;  %v4210_v24 = vld [vmem:[#allocation34_spill] sm:$0xff] }
 0x186   : > { %v1815_v39 = vpop.f32.mrf.mxu0  ;;  %v2830_v58 = vpop.f32.mrf.mxu1  ;;  %v1257_v55 = vadd.f32 %v4210_v24, %v4209_v36  ;;  %v1587_v17 = vadd.f32 %v4211_v62, %v1264_v19 }
 0x187   : > { %2177 = vst.msk [vmem:[%s3827_s8 + $0x80] sm:$0xff] %vm2160_vm1, %v2067_v52  ;;  %v1816_v16 = vadd.f32 %v1815_v39, %v1515_v2  ;;  %v2085_v23 = vadd.f32 %v2830_v58, %v1822_v13  ;;  %v4213_v13 = vld [vmem:[#allocation36_spill] sm:$0xff] }
 0x188   : > { %v2773_v40 = vpop.f32.mrf.mxu0  ;;  %v2078_v32 = vpop.f32.mrf.mxu1  ;;  %v1278_v52 = vadd.f32 %v4213_v13, %v4212_v9  ;;  %v1579_v56 = vadd.f32 %v4214_v14, %v1257_v55 }
 0x189   : > { %2180 = vst.msk [vmem:[%s3827_s8 + $0x98] sm:$0xff] %vm2160_vm1, %v2085_v23  ;;  %v1834_v38 = vadd.f32 %v2773_v40, %v1539_v28  ;;  %v2079_v3 = vadd.f32 %v2078_v32, %v1816_v16  ;;  %v4216_v16 = vld [vmem:[#allocation38_spill] sm:$0xff] }
 0x18a   : > { %v1827_v59 = vpop.f32.mrf.mxu0  ;;  %v2833_v5 = vpop.f32.mrf.mxu1  ;;  %v1271_v23 = vadd.f32 %v4216_v16, %v4215_v35  ;;  %v1603_v49 = vadd.f32 %v3802_v33, %v1278_v52 }
 0x18b   : > { %2179 = vst.msk [vmem:[%s3827_s8 + $0x90] sm:$0xff] %vm2160_vm1, %v2079_v3  ;;  %v1828_v22 = vadd.f32 %v1827_v59, %v1531_v0  ;;  %v2097_v34 = vadd.f32 %v2833_v5, %v1834_v38  ;;  %v1292_v38 = vadd.f32 %v4218_v1, %v4217_v61 }
 0x18c   : > { %v2776_v25 = vpop.f32.mrf.mxu0  ;;  %v2090_v44 = vpop.f32.mrf.mxu1 }
 0x18d   : > { %2182 = vst.msk [vmem:[%s3827_s8 + $0xa8] sm:$0xff] %vm2160_vm1, %v2097_v34  ;;  %v1846_v46 = vadd.f32 %v2776_v25, %v1555_v15  ;;  %v2091_v37 = vadd.f32 %v2090_v44, %v1828_v22  ;;  %v4219_v15 = vld [vmem:[#allocation40_spill] sm:$0xff]  ;;  %v1619_v44 = vadd.f32 %v3812_v60, %v1292_v38 }
 0x18e   : > { %v1839_v57 = vpop.f32.mrf.mxu0  ;;  %v2836_v27 = vpop.f32.mrf.mxu1  ;;  %v1595_v43 = vadd.f32 %v4219_v15, %v1271_v23 }
 0x18f   : > { %2181 = vst.msk [vmem:[%s3827_s8 + $0xa0] sm:$0xff] %vm2160_vm1, %v2091_v37  ;;  %v1840_v4 = vadd.f32 %v1839_v57, %v1547_v18  ;;  %v2109_v50 = vadd.f32 %v2836_v27, %v1846_v46  ;;  %v1611_v46 = vadd.f32 %v4221_v8, %v1285_v51 }
 0x190   : > { %v2779_v20 = vpop.f32.mrf.mxu0  ;;  %v2102_v10 = vpop.f32.mrf.mxu1 }
 0x191   : > { %2184 = vst.msk [vmem:[%s3827_s8 + $0xb8] sm:$0xff] %vm2160_vm1, %v2109_v50  ;;  %v1858_v48 = vadd.f32 %v2779_v20, %v1571_v26  ;;  %v2103_v53 = vadd.f32 %v2102_v10, %v1840_v4 }
 0x192   : > { %v1851_v29 = vpop.f32.mrf.mxu0  ;;  %v2839_v2 = vpop.f32.mrf.mxu1 }
 0x193   : > { %2183 = vst.msk [vmem:[%s3827_s8 + $0xb0] sm:$0xff] %vm2160_vm1, %v2103_v53  ;;  %v1852_v39 = vadd.f32 %v1851_v29, %v1563_v6  ;;  %v2121_v58 = vadd.f32 %v2839_v2, %v1858_v48 }
 0x194   : > { %v2782_v7 = vpop.f32.mrf.mxu0  ;;  %v2114_v28 = vpop.f32.mrf.mxu1 }
 0x195   : > { %2186 = vst.msk [vmem:[%s3827_s8 + $0xc8] sm:$0xff] %vm2160_vm1, %v2121_v58  ;;  %v1870_v40 = vadd.f32 %v2782_v7, %v1587_v17  ;;  %v2115_v32 = vadd.f32 %v2114_v28, %v1852_v39 }
 0x196   : > { %v1863_v12 = vpop.f32.mrf.mxu0  ;;  %v2842_v0 = vpop.f32.mrf.mxu1 }
 0x197   : > { %2185 = vst.msk [vmem:[%s3827_s8 + $0xc0] sm:$0xff] %vm2160_vm1, %v2115_v32  ;;  %v1864_v3 = vadd.f32 %v1863_v12, %v1579_v56  ;;  %v2133_v59 = vadd.f32 %v2842_v0, %v1870_v40 }
 0x198   : > { %v2785_v5 = vpop.f32.mrf.mxu0  ;;  %v2126_v63 = vpop.f32.mrf.mxu1 }
 0x199   : > { %2188 = vst.msk [vmem:[%s3827_s8 + $0xd8] sm:$0xff] %vm2160_vm1, %v2133_v59  ;;  %v1882_v22 = vadd.f32 %v2785_v5, %v1603_v49  ;;  %v2127_v33 = vadd.f32 %v2126_v63, %v1864_v3 }
 0x19a   : > { %v1875_v34 = vpop.f32.mrf.mxu0  ;;  %v2845_v25 = vpop.f32.mrf.mxu1 }
 0x19b   : > { %2187 = vst.msk [vmem:[%s3827_s8 + $0xd0] sm:$0xff] %vm2160_vm1, %v2127_v33  ;;  %v1876_v11 = vadd.f32 %v1875_v34, %v1595_v43  ;;  %v2145_v18 = vadd.f32 %v2845_v25, %v1882_v22 }
 0x19c   : > { %v2788_v30 = vpop.f32.mrf.mxu0  ;;  %v2138_v41 = vpop.f32.mrf.mxu1 }
 0x19d   : > { %2190 = vst.msk [vmem:[%s3827_s8 + $0xe8] sm:$0xff] %vm2160_vm1, %v2145_v18  ;;  %v1894_v42 = vadd.f32 %v2788_v30, %v1619_v44  ;;  %v2139_v37 = vadd.f32 %v2138_v41, %v1876_v11 }
 0x19e   : > { %v1887_v57 = vpop.f32.mrf.mxu0  ;;  %v2848_v27 = vpop.f32.mrf.mxu1 }
 0x19f   : > { %2189 = vst.msk [vmem:[%s3827_s8 + $0xe0] sm:$0xff] %vm2160_vm1, %v2139_v37  ;;  %v1888_v54 = vadd.f32 %v1887_v57, %v1611_v46  ;;  %v2157_v60 = vadd.f32 %v2848_v27, %v1894_v42 }
 0x1a0   : > { %v2150_v26 = vpop.f32.mrf.mxu1 }
 0x1a1   : > { %2192 = vst.msk [vmem:[%s3827_s8 + $0xf8] sm:$0xff] %vm2160_vm1, %v2157_v60  ;;  %v2151_v47 = vadd.f32 %v2150_v26, %v1888_v54 }
 0x1a3   : > { %2191 = vst.msk [vmem:[%s3827_s8 + $0xf0] sm:$0xff] %vm2160_vm1, %v2151_v47 }
 0x1a4 PF: > { %s13_s12 = sadd.s32 1, %s2863_s12  }
 0x1a5   : > { %p10_p4 = scmp.ge.s32.totalorder %s13_s12, 4  }
 0x1a7   :  { %12 = sbr.rel (!%p10_p4) target bundleno = 1 (0x1), region = 62 }

</bundles_post_ra>
